<compile_context>
chip_gen: v7x
topology: tpu7x:2x2x1
jax: 0.10.0
libtpu: 0.0.40
codegen_flags: <defaults>
</compile_context>

<pallas_src>
import math

import jax
import jax.numpy as jnp
from jax import lax
from jax.experimental import pallas as pl
from jax.experimental.pallas import tpu as pltpu


# ----------------------------------------------------------------------------
# Glue: synthetic stand-ins for the undisclosed circuit helpers
# ----------------------------------------------------------------------------
def wiresID_from_actionID_fun(actionlist, Nq):
    """Each action id selects a pair of wires; Depth = len(actionlist)."""
    return [(int(a) % Nq, (int(a) + 1) % Nq) for a in actionlist]


def uniform_rand_theta(key, n):
    """Deterministic uniform angles in [0, 2*pi)."""
    return jax.random.uniform(
        key, (n,), minval=0.0, maxval=2.0 * math.pi, dtype=jnp.float32
    )


def measurement_circuit_fun(x, wiresIDSet, paramsSet):
    """Synthetic differentiable stand-in for the parameterized measurement
    circuit: returns one scalar 'expectation value' per input sample."""
    out = jnp.float32(0.0)
    for d, (w0, w1) in enumerate(wiresIDSet):
        t0 = paramsSet[d, 0]
        t1 = paramsSet[d, 1]
        t2 = paramsSet[d, 2]
        out = out + jnp.cos(t0 * x[w0]) * jnp.sin(t1 * x[w1]) + t2 * x[w0] * x[w1]
    return out


# ----------------------------------------------------------------------------
# Pallas kernel: tiled / pipelined Fisher matrix  F = (1/N) * J^T J
# ----------------------------------------------------------------------------
def _round_up(x, m):
    return ((x + m - 1) // m) * m


def _num_tensorcores():
    """2 TensorCores per chip on v7x, 1 on v5e/v6e; safe fallback 1."""
    try:
        kind = jax.devices()[0].device_kind.lower()
    except Exception:
        return 1
    return 2 if "v7" in kind else 1


def _fisher_kernel(j_ref, f_ref, acc_ref):
    # j_ref  : (1, tN, P)  tile of the (un-padded-P) Jacobian, auto-pipelined
    # f_ref  : (1, P, P)   partial (unscaled) Fisher for this N-split
    # acc_ref: (P, P) f32 accumulator, persistent across the reduction axis
    k = pl.program_id(1)

    @pl.when(k == 0)
    def _():
        acc_ref[...] = jnp.zeros_like(acc_ref)

    j = j_ref[0]  # (tN, P)
    # Contract over the sample axis (axis 0) of both operands directly:
    # no explicit j.T -> no per-tile XLU relayout, MXU gets the transposed
    # operand natively.
    acc_ref[...] += lax.dot_general(
        j, j,
        dimension_numbers=(((0,), (0,)), ((), ())),
        preferred_element_type=jnp.float32,
    )

    @pl.when(k == pl.num_programs(1) - 1)
    def _():
        # Unscaled writeback; the single 1/N scale happens once in the wrapper
        # after the per-split partials are combined.
        f_ref[0] = acc_ref[...]


def fisher_matrix_pallas(J, *, tile_n=16384, num_splits=None,
                         small_bytes_bypass=64 * 1024):
    """Fisher = (1/N) * J^T @ J, streamed over the N (sample) axis.

    - P is left UN-padded: each block spans the full last dim so the HBM
      stream is exactly N*P floats (no lane-padding inflation, no extra
      padded-copy pass).
    - N is zero-padded only up to the tile (zero rows contribute zero).
    - tile_n defaults to 16384 rows: the VMEM input buffer is lane-padded to
      128 internally (~8 MiB/buffer, 2x double-buffered = 16 MiB) which fits
      the 32 MiB scoped VMEM budget on v5e/v6e (128 MiB phys) and v7x
      (64 MiB phys per core) alike, while amortizing the ~0.35 us/step cost.
    - The leading "parallel" split over N is only used on multi-TensorCore
      v7x; on single-TC v5e/v6e it defaults to 1 (no wasted padding/flush).
    """
    N, P = J.shape
    J = J.astype(jnp.float32)

    # Small-N bypass: a pallas_call here would be pure launch + pad overhead.
    if N * P * 4 < small_bytes_bypass:
        return (J.T @ J) * (1.0 / float(N))

    if num_splits is None:
        num_splits = _num_tensorcores()

    rows_per_split = pl.cdiv(N, num_splits)
    tN = min(tile_n, _round_up(rows_per_split, 8))    # sublane-aligned N tile
    rows_p = _round_up(rows_per_split, tN)
    Np = num_splits * rows_p

    if Np != N:
        Jp = jnp.zeros((Np, P), jnp.float32).at[:N].set(J)
    else:
        Jp = J
    Jp = Jp.reshape(num_splits, rows_p, P)
    kt = rows_p // tN

    cost = pl.CostEstimate(
        flops=2 * Np * P * P,
        transcendentals=0,
        bytes_accessed=4 * (Np * P + num_splits * P * P),
    )

    partials = pl.pallas_call(
        _fisher_kernel,
        out_shape=jax.ShapeDtypeStruct((num_splits, P, P), jnp.float32),
        grid_spec=pltpu.PrefetchScalarGridSpec(
            num_scalar_prefetch=0,
            grid=(num_splits, kt),
            # (1, tN, P): last dim equals the full array dim -> legal block,
            # contiguous in HBM; tN is a multiple of 8 (sublane aligned).
            in_specs=[pl.BlockSpec((1, tN, P), lambda c, k: (c, k, 0))],
            out_specs=pl.BlockSpec((1, P, P), lambda c, k: (c, 0, 0)),
            scratch_shapes=[pltpu.VMEM((P, P), jnp.float32)],
        ),
        compiler_params=pltpu.CompilerParams(
            dimension_semantics=("parallel", "arbitrary"),
            # ~16 MiB double-buffered input at tN=16384 (lane-padded in VMEM)
            # + tiny acc/out; 32 MiB leaves headroom on every generation.
            vmem_limit_bytes=32 * 1024 * 1024,
        ),
        cost_estimate=cost,
    )(Jp)

    # Combine per-split partial sums, apply the 1/N scale exactly once.
    return jnp.sum(partials, axis=0) * (1.0 / float(N))


# ----------------------------------------------------------------------------
# Spectrum + rank (eigvalsh stays in jnp; rank reduction fuses into its epilogue)
# ----------------------------------------------------------------------------
def eig_fun(fisher):
    # Fisher is symmetric PSD -> eigvalsh == real(eigvals) sorted ascending,
    # exactly what the torch eig_fun (eigvals -> real -> sort) produces.
    # Symmetrize to kill f32 rounding asymmetry from tiled accumulation.
    # TODO(synk): eigendecomposition has no Pallas/TPU kernel equivalent;
    # it stays in jnp.linalg.
    sym = 0.5 * (fisher + fisher.T)
    return jnp.linalg.eigvalsh(sym)


def matrix_rank_from_spectrum(eigvals, P):
    # Mirrors torch.linalg.matrix_rank default: tol = sv_max * max(M,N) * eps,
    # rank = count(sv > tol), with sv = |eigenvalues| for the PSD Fisher.
    # (Plain jnp: P floats — a pallas_call here would be pure launch overhead.)
    sv = jnp.abs(eigvals)
    tol = jnp.max(sv) * (float(P) * jnp.finfo(jnp.float32).eps)
    return jnp.sum(sv > tol).astype(jnp.int32)


# ----------------------------------------------------------------------------
# Module port
# ----------------------------------------------------------------------------
class EffectiveRankPallas:
    """JAX/Pallas port of effective_rank_class."""

    def __init__(self, Nq, InputX, measurement_circuit_fun):
        self.Nq = Nq
        self.InputX = InputX
        self.measurement_circuit_fun = measurement_circuit_fun

    def forward(self, actionlist, key):
        wiresIDSet = wiresID_from_actionID_fun(actionlist, self.Nq)
        Depth = len(wiresIDSet)
        paramsSet = uniform_rand_theta(key, Depth * 3).reshape(Depth, 3)

        # Per-sample gradient wrt params -> Jacobian J of shape (N, P).
        def f_of_params(params, x):
            return self.measurement_circuit_fun(x, wiresIDSet, params)

        grad_fn = jax.grad(f_of_params, argnums=0)
        # TODO(synk): for very large N, fuse the Jacobian computation into the
        # Fisher kernel (stream (tN, Nq) tiles of InputX, build grad rows in
        # VMEM, accumulate J_tile^T J_tile directly) to avoid the HBM
        # round-trip of J. Streaming J as bf16 is another ~2x on HBM bytes but
        # must be validated against the matrix_rank tolerance first.
        J = jax.vmap(lambda x: grad_fn(paramsSet, x).reshape(-1))(self.InputX)
        J = J.astype(jnp.float32)

        # Fisher matrix (tiled, pipelined Pallas MXU kernel).
        fisher_matrix = fisher_matrix_pallas(J)

        # Spectrum + rank (rank threshold mirrors torch.linalg.matrix_rank).
        spectrum = eig_fun(fisher_matrix)
        rank_F = matrix_rank_from_spectrum(spectrum, fisher_matrix.shape[0])
        num_theta = spectrum.shape[0]  # mirrors len(spectrum) in the module
        del num_theta

        return rank_F.reshape(1), spectrum, fisher_matrix


# ----------------------------------------------------------------------------
if __name__ == "__main__":
    key = jax.random.PRNGKey(0)
    k_x, k_theta = jax.random.split(key)

    Nq = 4
    N = 2048  # large enough to exercise the Pallas fisher kernel (no bypass)
    InputX = jax.random.normal(k_x, (N, Nq), dtype=jnp.float32)
    actionlist = [0, 1, 2, 3, 1, 2]  # Depth = 6  ->  P = 18 parameters

    model = EffectiveRankPallas(Nq, InputX, measurement_circuit_fun)
    rank, spectrum, fisher = model.forward(actionlist, k_theta)

    jax.block_until_ready((rank, spectrum, fisher))

    # Reference check: Fisher from the Pallas kernel vs plain jnp.
    def f_of_params(params, x):
        return measurement_circuit_fun(
            x, wiresID_from_actionID_fun(actionlist, Nq), params
        )

    paramsSet_ref = uniform_rand_theta(k_theta, len(actionlist) * 3).reshape(-1, 3)
    J_ref = jax.vmap(
        lambda x: jax.grad(f_of_params)(paramsSet_ref, x).reshape(-1)
    )(InputX).astype(jnp.float32)
    fisher_ref = (J_ref.T @ J_ref) / float(N)
    assert jnp.allclose(fisher, fisher_ref, rtol=1e-5, atol=1e-5)

    # mirrors `return rank_F.reshape(1).tolist()`
    rank_list = jax.device_get(rank).tolist()
    assert len(rank_list) == 1 and isinstance(rank_list[0], int)
    assert fisher.shape == (len(actionlist) * 3, len(actionlist) * 3)
    assert spectrum.shape == (len(actionlist) * 3,)

    print("KERNEL_OK")
</pallas_src>

<mosaic_0001>
module attributes {stable_mosaic.version = 11 : i64} {
  func.func @_fisher_kernel(%arg0: i32, %arg1: i32, %arg2: memref<1x2048x18xf32, #tpu.memory_space<vmem>>, %arg3: memref<1x18x18xf32, #tpu.memory_space<vmem>>, %arg4: memref<18x18xf32, #tpu.memory_space<vmem>>) attributes {dimension_semantics = [#tpu.dimension_semantics<parallel>, #tpu.dimension_semantics<arbitrary>], iteration_bounds = array<i64: 1, 1>, scalar_prefetch = 0 : i64, scratch_operands = 1 : i64, tpu.core_type = #tpu.core_type<tc>, window_params = [{transform_indices = @transform_0, window_bounds = array<i64: 1, 2048, 18>}, {transform_indices = @transform_1, window_bounds = array<i64: 1, 18, 18>}]} {
    %c0_i32 = arith.constant 0 : i32
    %0 = arith.cmpi eq, %arg1, %c0_i32 : i32
    %1 = arith.extui %0 : i1 to i32
    %c0_i32_0 = arith.constant 0 : i32
    %2 = arith.cmpi ne, %1, %c0_i32_0 : i32
    scf.if %2 {
      %cst_9 = arith.constant 0.000000e+00 : f32
      %12 = vector.broadcast %cst_9 : f32 to vector<18x18xf32>
      %c0_10 = arith.constant 0 : index
      %c0_11 = arith.constant 0 : index
      %13 = vector.load %arg4[%c0_10, %c0_11] : memref<18x18xf32, #tpu.memory_space<vmem>>, vector<18x18xf32>
      tpu.vector_store %arg4[%c0_10, %c0_11], %12 {strides = array<i32>} : memref<18x18xf32, #tpu.memory_space<vmem>>, vector<18x18xf32>,
    } else {
    }
    %c0 = arith.constant 0 : index
    %c0_1 = arith.constant 0 : index
    %c0_2 = arith.constant 0 : index
    %3 = vector.load %arg2[%c0, %c0_1, %c0_2] : memref<1x2048x18xf32, #tpu.memory_space<vmem>>, vector<1x2048x18xf32>
    %4 = vector.shape_cast %3 : vector<1x2048x18xf32> to vector<2048x18xf32>
    %c0_3 = arith.constant 0 : index
    %c0_4 = arith.constant 0 : index
    %5 = vector.load %arg4[%c0_3, %c0_4] : memref<18x18xf32, #tpu.memory_space<vmem>>, vector<18x18xf32>
    %cst = arith.constant dense<0.000000e+00> : vector<18x18xf32>
    %6 = tpu.matmul %4, %4, %cst {dimension_numbers = #tpu.dot_dimension_numbers<[0], [0], [1], [1], [0, 1, 1, 1], [], []>} : vector<2048x18xf32>, vector<2048x18xf32>, vector<18x18xf32> -> vector<18x18xf32>
    %7 = arith.addf %5, %6 : vector<18x18xf32>
    %c0_5 = arith.constant 0 : index
    %c0_6 = arith.constant 0 : index
    %8 = vector.load %arg4[%c0_5, %c0_6] : memref<18x18xf32, #tpu.memory_space<vmem>>, vector<18x18xf32>
    tpu.vector_store %arg4[%c0_5, %c0_6], %7 {strides = array<i32>} : memref<18x18xf32, #tpu.memory_space<vmem>>, vector<18x18xf32>,
    %c0_i32_7 = arith.constant 0 : i32
    %9 = arith.cmpi eq, %arg1, %c0_i32_7 : i32
    %10 = arith.extui %9 : i1 to i32
    %c0_i32_8 = arith.constant 0 : i32
    %11 = arith.cmpi ne, %10, %c0_i32_8 : i32
    scf.if %11 {
      %c0_9 = arith.constant 0 : index
      %c0_10 = arith.constant 0 : index
      %12 = vector.load %arg4[%c0_9, %c0_10] : memref<18x18xf32, #tpu.memory_space<vmem>>, vector<18x18xf32>
      %c0_11 = arith.constant 0 : index
      %c0_12 = arith.constant 0 : index
      %c0_13 = arith.constant 0 : index
      %13 = vector.load %arg3[%c0_11, %c0_12, %c0_13] : memref<1x18x18xf32, #tpu.memory_space<vmem>>, vector<1x18x18xf32>
      %14 = vector.shape_cast %13 : vector<1x18x18xf32> to vector<18x18xf32>
      %15 = vector.shape_cast %12 : vector<18x18xf32> to vector<1x18x18xf32>
      tpu.vector_store %arg3[%c0_11, %c0_12, %c0_13], %15 {strides = array<i32>} : memref<1x18x18xf32, #tpu.memory_space<vmem>>, vector<1x18x18xf32>,
    } else {
    }
    return
  }
  func.func @transform_0(%arg0: i32, %arg1: i32) -> (i32, i32, i32) {
    %c0_i32 = arith.constant 0 : i32
    %c0_i32_0 = arith.constant 0 : i32
    return %arg0, %arg1, %c0_i32 : i32, i32, i32
  }
  func.func @transform_1(%arg0: i32, %arg1: i32) -> (i32, i32, i32) {
    %c0_i32 = arith.constant 0 : i32
    %c0_i32_0 = arith.constant 0 : i32
    %c0_i32_1 = arith.constant 0 : i32
    return %arg0, %c0_i32, %c0_i32_0 : i32, i32, i32
  }
}

</mosaic_0001>

<bundles_post_ra>
// kernel: tpu_custom_call.1
= control target key start
LH: loop header
LB: loop body
LE: loop exit
PB: predicated region body
PF: predicated region fallthrough
CT: control target
= control target key end

     0   :  { %vm12_vm0 = vcmask 146432   ;;  %vm15_vm1 = vcmask 140288   ;;  %s4221_s0 = inlined_call_operand.vmem [shape: f32[1,2048,18], index: 0, kind: input, shape index: {}]   ;;  %s4222_s1 = inlined_call_operand.vmem [shape: f32[1,18,18], index: 1, kind: output, shape index: {}]  }
   0x1   :  { %v2424_v0 = vld [vmem:[%s4221_s0 + $0x100] sm:$0xff]  ;;  %v2446_v5 = vld [vmem:[%s4221_s0 + $0x108] sm:$0xff]  ;;  %v2472_v12 = vld [vmem:[%s4221_s0 + $0x110] sm:$0xff] }
   0x2   :  { %v2429_v1 = vld [vmem:[%s4221_s0 + $0x180] sm:$0xff]  ;;  %v2451_v6 = vld [vmem:[%s4221_s0 + $0x188] sm:$0xff]  ;;  %v2477_v13 = vld [vmem:[%s4221_s0 + $0x190] sm:$0xff] }
   0x3   :  { %v2434_v2 = vld [vmem:[%s4221_s0] sm:$0xff]  ;;  %v2081_v3 = vpack.i.bf16 %v2429_v1, %v2424_v0  ;;  %v2458_v8 = vld [vmem:[%s4221_s0 + $0x8] sm:$0xff]  ;;  %v2083_v10 = vpack.i.bf16 %v2451_v6, %v2446_v5  ;;  %v2482_v14 = vld [vmem:[%s4221_s0 + $0x10] sm:$0xff]  ;;  %v2085_v16 = vpack.i.bf16 %v2477_v13, %v2472_v12 }
   0x4   :  { %v2441_v4 = vld [vmem:[%s4221_s0 + $0x80] sm:$0xff]  ;;  %v2463_v9 = vld [vmem:[%s4221_s0 + $0x88] sm:$0xff]  ;;  %v2487_v15 = vld [vmem:[%s4221_s0 + $0x90] sm:$0xff] }
   0x5   :  { %v2034_v7 = vpack.i.bf16 %v2441_v4, %v2434_v2  ;;  %2082 = vxpose.xlu1.b32.start [1/16] (narrow) %v2081_v3, 24  ;;  %v2036_v11 = vpack.i.bf16 %v2463_v9, %v2458_v8  ;;  %v2038_v17 = vpack.i.bf16 %v2487_v15, %v2482_v14  ;;  %v2496_v18 = vld [vmem:[%s4221_s0 + $0x118] sm:$0xff]  ;;  %v2520_v24 = vld [vmem:[%s4221_s0 + $0x120] sm:$0xff]  ;;  %v2544_v30 = vld [vmem:[%s4221_s0 + $0x128] sm:$0xff] }
   0x6   :  { %v2501_v19 = vld [vmem:[%s4221_s0 + $0x198] sm:$0xff]  ;;  %v2525_v25 = vld [vmem:[%s4221_s0 + $0x1a0] sm:$0xff]  ;;  %v2549_v31 = vld [vmem:[%s4221_s0 + $0x1a8] sm:$0xff] }
   0x7   :  { %2035 = vxpose.xlu0.b32.start [1/16] (narrow) %v2034_v7, 24  ;;  %v2506_v20 = vld [vmem:[%s4221_s0 + $0x18] sm:$0xff]  ;;  %v2087_v22 = vpack.i.bf16 %v2501_v19, %v2496_v18  ;;  %v2530_v26 = vld [vmem:[%s4221_s0 + $0x20] sm:$0xff]  ;;  %v2089_v28 = vpack.i.bf16 %v2525_v25, %v2520_v24  ;;  %v2554_v32 = vld [vmem:[%s4221_s0 + $0x28] sm:$0xff]  ;;  %v2091_v34 = vpack.i.bf16 %v2549_v31, %v2544_v30 }
   0x8   :  { %v2511_v21 = vld [vmem:[%s4221_s0 + $0x98] sm:$0xff]  ;;  %v2535_v27 = vld [vmem:[%s4221_s0 + $0xa0] sm:$0xff]  ;;  %v2559_v33 = vld [vmem:[%s4221_s0 + $0xa8] sm:$0xff] }
   0x9   :  { %2084 = vxpose.xlu1.b32.cont [2/16] (narrow) %v2083_v10, 24  ;;  %v2040_v23 = vpack.i.bf16 %v2511_v21, %v2506_v20  ;;  %v2042_v29 = vpack.i.bf16 %v2535_v27, %v2530_v26  ;;  %v2044_v35 = vpack.i.bf16 %v2559_v33, %v2554_v32  ;;  %v2568_v36 = vld [vmem:[%s4221_s0 + $0x130] sm:$0xff]  ;;  %v2588_v40 = vld [vmem:[%s4221_s0 + $0x300] sm:$0xff]  ;;  %v2593_v41 = vld [vmem:[%s4221_s0 + $0x308] sm:$0xff] }
   0xa   :  { %v2573_v37 = vld [vmem:[%s4221_s0 + $0x1b0] sm:$0xff]  ;;  %v2602_v44 = vld [vmem:[%s4221_s0 + $0x200] sm:$0xff]  ;;  %v2607_v45 = vld [vmem:[%s4221_s0 + $0x208] sm:$0xff] }
   0xb   :  { %2037 = vxpose.xlu0.b32.cont [2/16] (narrow) %v2036_v11, 24  ;;  %v2578_v38 = vld [vmem:[%s4221_s0 + $0x30] sm:$0xff]  ;;  %v2093_v43 = vpack.i.bf16 %v2573_v37, %v2568_v36  ;;  %v2614_v47 = vld [vmem:[%s4221_s0 + $0x138] sm:$0xff]  ;;  %v2640_v54 = vld [vmem:[%s4221_s0 + $0x140] sm:$0xff] }
   0xc   :  { %v2583_v39 = vld [vmem:[%s4221_s0 + $0xb0] sm:$0xff]  ;;  %v2619_v48 = vld [vmem:[%s4221_s0 + $0x1b8] sm:$0xff]  ;;  %v2645_v55 = vld [vmem:[%s4221_s0 + $0x1c0] sm:$0xff] }
   0xd   :  { %2086 = vxpose.xlu1.b32.cont [3/16] (narrow) %v2085_v16, 24  ;;  %v2046_v46 = vpack.i.bf16 %v2583_v39, %v2578_v38  ;;  %v2626_v50 = vld [vmem:[%s4221_s0 + $0x38] sm:$0xff]  ;;  %v2095_v52 = vpack.i.bf16 %v2619_v48, %v2614_v47  ;;  %v2650_v56 = vld [vmem:[%s4221_s0 + $0x40] sm:$0xff]  ;;  %v2097_v58 = vpack.i.bf16 %v2645_v55, %v2640_v54  ;;  %v2664_v60 = vld [vmem:[%s4221_s0 + $0x148] sm:$0xff] }
   0xe   :  { %v2631_v51 = vld [vmem:[%s4221_s0 + $0xb8] sm:$0xff]  ;;  %v2655_v57 = vld [vmem:[%s4221_s0 + $0xc0] sm:$0xff]  ;;  %v2669_v61 = vld [vmem:[%s4221_s0 + $0x1c8] sm:$0xff] }
   0xf   :  { %2039 = vxpose.xlu0.b32.cont [3/16] (narrow) %v2038_v17, 24  ;;  %v2048_v53 = vpack.i.bf16 %v2631_v51, %v2626_v50  ;;  %v2050_v59 = vpack.i.bf16 %v2655_v57, %v2650_v56  ;;  %v2674_v62 = vld [vmem:[%s4221_s0 + $0x48] sm:$0xff]  ;;  %v2099_v3 = vpack.i.bf16 %v2669_v61, %v2664_v60  ;;  %v2688_v10 = vld [vmem:[%s4221_s0 + $0x150] sm:$0xff] }
  0x10   :  { %v2679_v63 = vld [vmem:[%s4221_s0 + $0xc8] sm:$0xff]  ;;  %v2693_v11 = vld [vmem:[%s4221_s0 + $0x1d0] sm:$0xff] }
  0x11   :  { %2088 = vxpose.xlu1.b32.cont [4/16] (narrow) %v2087_v22, 24  ;;  %v2052_v7 = vpack.i.bf16 %v2679_v63, %v2674_v62  ;;  %v2698_v16 = vld [vmem:[%s4221_s0 + $0x50] sm:$0xff]  ;;  %v1781_v22 = vpack.c.bf16 %v2511_v21, %v2487_v15  ;;  %v1809_v15 = vpack.c.bf16 %v2451_v6, %v2429_v1  ;;  %v1811_v21 = vpack.c.bf16 %v2446_v5, %v2424_v0  ;;  %v2755_v0 = vld [vmem:[%s4221_s0 + $0x500] sm:$0xff]  ;;  %v2760_v1 = vld [vmem:[%s4221_s0 + $0x508] sm:$0xff] }
  0x12   :  { %v2703_v17 = vld [vmem:[%s4221_s0 + $0xd0] sm:$0xff]  ;;  %4275 = vst [vmem:[#allocation3_spill] sm:$0xff] %v2755_v0  ;;  %4276 = vst [vmem:[#allocation4_spill] sm:$0xff] %v2760_v1  ;;  %v2767_v6 = vld [vmem:[%s4221_s0 + $0x1e0] sm:$0xff] }
  0x13   :  { %2041 = vxpose.xlu0.b32.cont [4/16] (narrow) %v2040_v23, 24  ;;  %v1777_v23 = vpack.c.bf16 %v2463_v9, %v2441_v4  ;;  %v2723_v4 = vld [vmem:[%s4221_s0 + $0x1d8] sm:$0xff]  ;;  %v1783_v9 = vpack.c.bf16 %v2506_v20, %v2482_v14  ;;  %v1813_v14 = vpack.c.bf16 %v2501_v19, %v2477_v13  ;;  %v1785_v20 = vpack.c.bf16 %v2559_v33, %v2535_v27  ;;  %v2774_v19 = vld [vmem:[%s4221_s0 + $0x400] sm:$0xff]  ;;  %v2779_v27 = vld [vmem:[%s4221_s0 + $0x408] sm:$0xff] }
  0x14   :  { %1810 = vmatprep.subr.bf16.mxu1 %v1809_v15  ;;  %4277 = vst [vmem:[#allocation5_spill] sm:$0xff] %v2774_v19  ;;  %4278 = vst [vmem:[#allocation6_spill] sm:$0xff] %v2779_v27  ;;  %v1815_v33 = vpack.c.bf16 %v2496_v18, %v2472_v12  ;;  %v1817_v12 = vpack.c.bf16 %v2549_v31, %v2525_v25  ;;  %v1789_v18 = vpack.c.bf16 %v2631_v51, %v2583_v39  ;;  %v2813_v25 = vld [vmem:[%s4221_s0 + $0x1e8] sm:$0xff] }
  0x15   :  { %2090 = vxpose.xlu1.b32.cont [5/16] (narrow) %v2089_v28, 24  ;;  %v2101_v28 = vpack.i.bf16 %v2693_v11, %v2688_v10  ;;  %1778 = vmatprep.subr.bf16.mxu0 %v1777_v23  ;;  %v1819_v31 = vpack.c.bf16 %v2544_v30, %v2520_v24  ;;  %v1791_v39 = vpack.c.bf16 %v2626_v50, %v2578_v38  ;;  %v2822_v51 = vld [vmem:[%s4221_s0 + $0x68] sm:$0xff]  ;;  %v2837_v50 = vld [vmem:[%s4221_s0 + $0x170] sm:$0xff] }
  0x16   :  { %1812 = vmatpush3.bf16.msra.mxu1 %v1811_v21  ;;  %v1793_v24 = vpack.c.bf16 %v2679_v63, %v2655_v57  ;;  %v1795_v57 = vpack.c.bf16 %v2674_v62, %v2650_v56  ;;  %v2851_v63 = vld [vmem:[%s4221_s0 + $0x70] sm:$0xff]  ;;  %v2866_v62 = vld [vmem:[%s4221_s0 + $0x178] sm:$0xff]  ;;  %v3204_v13 = vld [vmem:[%s4221_s0 + $0x368] sm:$0xff] }
  0x17   :  { %2043 = vxpose.xlu0.b32.cont [5/16] (narrow) %v2042_v29, 24  ;;  %v1779_v29 = vpack.c.bf16 %v2458_v8, %v2434_v2  ;;  %v2730_v2 = vld [vmem:[%s4221_s0 + $0x58] sm:$0xff]  ;;  %1814 = vmatprep.subr.bf16.mxu1 %v1813_v14  ;;  %v47_v23 = vld [vmem:[%s4221_s0 + $0xf0] sm:$0xff]  ;;  %4285 = vst [vmem:[#allocation13_spill] sm:$0xff] %v3204_v13 }
  0x18   :  { %v2735_v8 = vld [vmem:[%s4221_s0 + $0xd8] sm:$0xff]  ;;  %v2062_v56 = vpack.i.bf16 %v47_v23, %v2851_v63 }
  0x19   :  { %2092 = vxpose.xlu1.b32.cont [6/16] (narrow) %v2091_v34, 24  ;;  %v2054_v34 = vpack.i.bf16 %v2703_v17, %v2698_v16  ;;  %1780 = vmatpush3.bf16.msra.mxu0 %v1779_v29  ;;  %v2056_v5 = vpack.i.bf16 %v2735_v8, %v2730_v2  ;;  %v32_v29 = vld [vmem:[%s4221_s0 + $0x78] sm:$0xff] }
  0x1a   :  { %1782 = vmatprep.subr.bf16.mxu0 %v1781_v22  ;;  %1816 = vmatpush3.bf16.msra.mxu1 %v1815_v33  ;;  %v1821_v22 = vpack.c.bf16 %v2619_v48, %v2573_v37  ;;  %v2842_v37 = vld [vmem:[%s4221_s0 + $0x1f0] sm:$0xff]  ;;  %v1823_v48 = vpack.c.bf16 %v2614_v47, %v2568_v36  ;;  %v1797_v36 = vpack.c.bf16 %v2735_v8, %v2703_v17  ;;  %v98_v33 = vld [vmem:[%s4221_s0 + $0x288] sm:$0xff] }
  0x1b   :  { %2045 = vxpose.xlu0.b32.cont [6/16] (narrow) %v2044_v35, 24  ;;  %v2718_v35 = vld [vmem:[%s4221_s0 + $0x158] sm:$0xff]  ;;  %1818 = vmatprep.subr.bf16.mxu1 %v1817_v12  ;;  %v2109_v47 = vpack.i.bf16 %v2842_v37, %v2837_v50  ;;  %v1799_v17 = vpack.c.bf16 %v2730_v2, %v2698_v16  ;;  %v129_v16 = vld [vmem:[%s4221_s0 + $0x380] sm:$0xff] }
  0x1c   :  { %v1831_v2 = vpack.c.bf16 %v2718_v35, %v2688_v10  ;;  %v2175_v14 = vpack.i.bf16 %v2588_v40, %v129_v16  ;;  %v130_v10 = vld [vmem:[%s4221_s0 + $0x388] sm:$0xff] }
  0x1d   :  { %2094 = vxpose.xlu1.b32.cont [7/16] (narrow) %v2093_v43, 24  ;;  %v2103_v43 = vpack.i.bf16 %v2723_v4, %v2718_v35  ;;  %1784 = vmatpush3.bf16.msra.mxu0 %v1783_v9  ;;  %v1829_v9 = vpack.c.bf16 %v2723_v4, %v2693_v11  ;;  %v97_v11 = vld [vmem:[%s4221_s0 + $0x280] sm:$0xff]  ;;  %v1833_v4 = vpack.c.bf16 %v2813_v25, %v2767_v6 }
  0x1e   :  { %1786 = vmatprep.subr.bf16.mxu0 %v1785_v20  ;;  %1820 = vmatpush3.bf16.msra.mxu1 %v1819_v31  ;;  %v2128_v35 = vpack.i.bf16 %v97_v11, %v2602_v44  ;;  %v2905_v20 = vld [vmem:[%s4221_s0 + $0x700] sm:$0xff]  ;;  %v2177_v12 = vpack.i.bf16 %v2593_v41, %v130_v10  ;;  %v1839_v31 = vpack.c.bf16 %v2866_v62, %v2837_v50  ;;  %v2974_v50 = vld [vmem:[%s4221_s0 + $0x218] sm:$0xff] }
  0x1f   :  { %2047 = vxpose.xlu0.b32.cont [7/16] (narrow) %v2046_v46, 24  ;;  %v2750_v46 = vld [vmem:[%s4221_s0 + $0x160] sm:$0xff]  ;;  %1822 = vmatprep.subr.bf16.mxu1 %v1821_v22  ;;  %4279 = vst [vmem:[#allocation7_spill] sm:$0xff] %v2905_v20 }
  0x21   :  { %2096 = vxpose.xlu1.b32.cont [8/16] (narrow) %v2095_v52, 24  ;;  %v1787_v52 = vpack.c.bf16 %v2554_v32, %v2530_v26  ;;  %v2105_v26 = vpack.i.bf16 %v2767_v6, %v2750_v46  ;;  %v1807_v6 = vpack.c.bf16 %v32_v29, %v2851_v63  ;;  %v2988_v63 = vld [vmem:[%s4221_s0 + $0x320] sm:$0xff] }
  0x22   :  { %1824 = vmatpush3.bf16.msra.mxu1 %v1823_v48 }
  0x23   :  { %2049 = vxpose.xlu0.b32.cont [8/16] (narrow) %v2048_v53, 24  ;;  %v2788_v53 = vld [vmem:[%s4221_s0 + $0x60] sm:$0xff]  ;;  %1788 = vmatpush3.bf16.msra.mxu0 %v1787_v52 }
  0x24   :  { %1790 = vmatprep.subr.bf16.mxu0 %v1789_v18  ;;  %v1803_v15 = vpack.c.bf16 %v2822_v51, %v2788_v53  ;;  %v2930_v18 = vld [vmem:[%s4221_s0 + $0x608] sm:$0xff] }
  0x25   :  { %2098 = vxpose.xlu1.b32.cont [9/16] (narrow) %v2097_v58, 24  ;;  %v2793_v58 = vld [vmem:[%s4221_s0 + $0xe0] sm:$0xff]  ;;  %4282 = vst [vmem:[#allocation10_spill] sm:$0xff] %v2930_v18  ;;  %v3228_v18 = vld [vmem:[%s4221_s0 + $0x370] sm:$0xff] }
  0x26   :  { %v2058_v32 = vpack.i.bf16 %v2793_v58, %v2788_v53  ;;  %4287 = vst [vmem:[#allocation15_spill] sm:$0xff] %v3228_v18 }
  0x27   :  { %2051 = vxpose.xlu0.b32.cont [9/16] (narrow) %v2050_v59, 24  ;;  %1792 = vmatpush3.bf16.msra.mxu0 %v1791_v39  ;;  %v2950_v39 = vld [vmem:[%s4221_s0 + $0x210] sm:$0xff]  ;;  %v3209_v59 = vld [vmem:[%s4221_s0 + $0x3e8] sm:$0xff] }
  0x28   :  { %1794 = vmatprep.subr.bf16.mxu0 %v1793_v24  ;;  %v2201_v42 = vpack.i.bf16 %v3204_v13, %v3209_v59  ;;  %v3252_v13 = vld [vmem:[%s4221_s0 + $0x378] sm:$0xff] }
  0x29   :  { %2100 = vxpose.xlu1.b32.cont [10/16] (narrow) %v2099_v3, 24  ;;  %v2808_v3 = vld [vmem:[%s4221_s0 + $0x168] sm:$0xff]  ;;  %4291 = vst [vmem:[#allocation19_spill] sm:$0xff] %v3252_v13 }
  0x2a   :  { %v2107_v30 = vpack.i.bf16 %v2813_v25, %v2808_v3 }
  0x2b   :  { %2053 = vxpose.xlu0.b32.cont [10/16] (narrow) %v2052_v7, 24  ;;  %v46_v7 = vld [vmem:[%s4221_s0 + $0xe8] sm:$0xff]  ;;  %1796 = vmatpush3.bf16.msra.mxu0 %v1795_v57 }
  0x2c   :  { %v2060_v38 = vpack.i.bf16 %v46_v7, %v2822_v51  ;;  %v1801_v8 = vpack.c.bf16 %v46_v7, %v2793_v58  ;;  %1798 = vmatprep.subr.bf16.mxu0 %v1797_v36  ;;  %v1841_v58 = vpack.c.bf16 %v98_v33, %v97_v11  ;;  %v2955_v51 = vld [vmem:[%s4221_s0 + $0x290] sm:$0xff]  ;;  %v1873_v7 = vpack.c.bf16 %v130_v10, %v129_v16  ;;  %v3003_v36 = vld [vmem:[%s4221_s0 + $0x2a0] sm:$0xff]  ;;  %v3065_v11 = vld [vmem:[%s4221_s0 + $0x3b8] sm:$0xff] }
  0x2d   :  { %2102 = vxpose.xlu1.b32.cont [11/16] (narrow) %v2101_v28, 24  ;;  %v1825_v28 = vpack.c.bf16 %v2669_v61, %v2645_v55  ;;  %v80_v55 = vld [vmem:[%s4221_s0 + $0x1f8] sm:$0xff]  ;;  %v1827_v61 = vpack.c.bf16 %v2664_v60, %v2640_v54  ;;  %v2132_v24 = vpack.i.bf16 %v2955_v51, %v2950_v39 }
  0x2e   :  { %v2111_v54 = vpack.i.bf16 %v80_v55, %v2866_v62  ;;  %v1837_v53 = vpack.c.bf16 %v80_v55, %v2842_v37  ;;  %v2979_v37 = vld [vmem:[%s4221_s0 + $0x298] sm:$0xff]  ;;  %v3012_v62 = vld [vmem:[%s4221_s0 + $0x328] sm:$0xff] }
  0x2f   :  { %2055 = vxpose.xlu0.b32.cont [11/16] (narrow) %v2054_v34, 24  ;;  %v48_v34 = vld [vmem:[%s4221_s0 + $0xf8] sm:$0xff]  ;;  %1826 = vmatprep.subr.bf16.mxu1 %v1825_v28  ;;  %v2134_v57 = vpack.i.bf16 %v2979_v37, %v2974_v50  ;;  %v2998_v28 = vld [vmem:[%s4221_s0 + $0x220] sm:$0xff]  ;;  %v3017_v55 = vld [vmem:[%s4221_s0 + $0x3a8] sm:$0xff] }
  0x30   :  { %v2064_v60 = vpack.i.bf16 %v48_v34, %v32_v29  ;;  %1828 = vmatpush3.bf16.msra.mxu1 %v1827_v61  ;;  %1800 = vmatpush3.bf16.msra.mxu0 %v1799_v17  ;;  %v1805_v21 = vpack.c.bf16 %v48_v34, %v47_v23  ;;  %v2993_v23 = vld [vmem:[%s4221_s0 + $0x3a0] sm:$0xff]  ;;  %v3022_v61 = vld [vmem:[%s4221_s0 + $0x228] sm:$0xff]  ;;  %v2185_v29 = vpack.i.bf16 %v3012_v62, %v3017_v55 }
  0x31   :  { %2104 = vxpose.xlu1.b32.cont [12/16] (narrow) %v2103_v43, 24  ;;  %1830 = vmatprep.subr.bf16.mxu1 %v1829_v9  ;;  %v2910_v43 = vld [vmem:[%s4221_s0 + $0x708] sm:$0xff]  ;;  %v3036_v9 = vld [vmem:[%s4221_s0 + $0x330] sm:$0xff] }
  0x32   :  { %1802 = vmatprep.subr.bf16.mxu0 %v1801_v8  ;;  %4280 = vst [vmem:[#allocation8_spill] sm:$0xff] %v2910_v43  ;;  %v3027_v17 = vld [vmem:[%s4221_s0 + $0x2a8] sm:$0xff]  ;;  %v3041_v8 = vld [vmem:[%s4221_s0 + $0x3b0] sm:$0xff] }
  0x33   :  { %2057 = vxpose.xlu0.b32.cont [12/16] (narrow) %v2056_v5, 24  ;;  %v1835_v5 = vpack.c.bf16 %v2808_v3, %v2750_v46  ;;  %v2925_v46 = vld [vmem:[%s4221_s0 + $0x600] sm:$0xff]  ;;  %v2941_v3 = vld [vmem:[%s4221_s0 + $0x390] sm:$0xff]  ;;  %v2138_v34 = vpack.i.bf16 %v3027_v17, %v3022_v61  ;;  %v2187_v16 = vpack.i.bf16 %v3036_v9, %v3041_v8 }
  0x34   :  { %1832 = vmatpush3.bf16.msra.mxu1 %v1831_v2  ;;  %1804 = vmatpush3.bf16.msra.mxu0 %v1803_v15  ;;  %4281 = vst [vmem:[#allocation9_spill] sm:$0xff] %v2925_v46  ;;  %v3060_v15 = vld [vmem:[%s4221_s0 + $0x338] sm:$0xff]  ;;  %v3233_v43 = vld [vmem:[%s4221_s0 + $0x3f0] sm:$0xff] }
  0x35   :  { %2106 = vxpose.xlu1.b32.cont [13/16] (narrow) %v2105_v26, 24  ;;  %1834 = vmatprep.subr.bf16.mxu1 %v1833_v4  ;;  %v2130_v26 = vpack.i.bf16 %v98_v33, %v2607_v45  ;;  %v3070_v4 = vld [vmem:[%s4221_s0 + $0x238] sm:$0xff]  ;;  %v3099_v33 = vld [vmem:[%s4221_s0 + $0x2c0] sm:$0xff]  ;;  %4288 = vst [vmem:[#allocation16_spill] sm:$0xff] %v3233_v43  ;;  %v2203_v46 = vpack.i.bf16 %v3228_v18, %v3233_v43 }
  0x36   :  { %1806 = vmatprep.subr.bf16.mxu0 %v1805_v21  ;;  %v3075_v21 = vld [vmem:[%s4221_s0 + $0x2b8] sm:$0xff]  ;;  %v3276_v43 = vld [vmem:[%s4221_s0 + $0x580] sm:$0xff] }
  0x37   :  { %2059 = vxpose.xlu0.b32.cont [13/16] (narrow) %v2058_v32, 24  ;;  %v2936_v32 = vld [vmem:[%s4221_s0 + $0x310] sm:$0xff]  ;;  %v2142_v10 = vpack.i.bf16 %v3075_v21, %v3070_v4  ;;  %4295 = vst [vmem:[#allocation23_spill] sm:$0xff] %v3276_v43 }
  0x38   :  { %1836 = vmatpush3.bf16.msra.mxu1 %v1835_v5  ;;  %1808 = vmatpush3.bf16.msra.mxu0 %v1807_v6  ;;  %v2179_v22 = vpack.i.bf16 %v2936_v32, %v2941_v3  ;;  %v3089_v5 = vld [vmem:[%s4221_s0 + $0x3c0] sm:$0xff] }
  0x39   :  { %2108 = vxpose.xlu1.b32.cont [14/16] (narrow) %v2107_v30, 24  ;;  %1838 = vmatprep.subr.bf16.mxu1 %v1837_v53  ;;  %v2964_v30 = vld [vmem:[%s4221_s0 + $0x318] sm:$0xff]  ;;  %v3094_v6 = vld [vmem:[%s4221_s0 + $0x240] sm:$0xff] }
  0x3a   :  { %1842 = vmatprep.subr.bf16.mxu0 %v1841_v58  ;;  %v2144_v58 = vpack.i.bf16 %v3099_v33, %v3094_v6 }
  0x3b   :  { %2061 = vxpose.xlu0.b32.cont [14/16] (narrow) %v2060_v38, 24  ;;  %v2969_v38 = vld [vmem:[%s4221_s0 + $0x398] sm:$0xff] }
  0x3c   :  { %1840 = vmatpush3.bf16.msra.mxu1 %v1839_v31  ;;  %v2181_v48 = vpack.i.bf16 %v2964_v30, %v2969_v38  ;;  %v3118_v31 = vld [vmem:[%s4221_s0 + $0x248] sm:$0xff] }
  0x3d   :  { %2110 = vxpose.xlu1.b32.cont [15/16] (narrow) %v2109_v47, 24  ;;  %1874 = vmatprep.subr.bf16.mxu1 %v1873_v7  ;;  %v2183_v47 = vpack.i.bf16 %v2988_v63, %v2993_v23  ;;  %v3123_v7 = vld [vmem:[%s4221_s0 + $0x2c8] sm:$0xff] }
  0x3f   :  { %2063 = vxpose.xlu0.b32.cont [15/16] (narrow) %v2062_v56, 24  ;;  %v2136_v56 = vpack.i.bf16 %v3003_v36, %v2998_v28 }
  0x41   :  { %2112 = vxpose.xlu1.b32.end [16/16] (narrow) %v2111_v54, 24  ;;  %v3046_v54 = vld [vmem:[%s4221_s0 + $0x230] sm:$0xff] }
  0x43   :  { %2065 = vxpose.xlu0.b32.end [16/16] (narrow) %v2064_v60, 24  ;;  %v3051_v60 = vld [vmem:[%s4221_s0 + $0x2b0] sm:$0xff] }
  0x44   :  { %v2140_v2 = vpack.i.bf16 %v3051_v60, %v3046_v54 }
  0x45   :  { %2176 = vxpose.xlu1.b32.start [1/16] (narrow) %v2175_v14, 24  ;;  %v2189_v14 = vpack.i.bf16 %v3060_v15, %v3065_v11 }
  0x47   :  { %2129 = vxpose.xlu0.b32.start [1/16] (narrow) %v2128_v35, 24  ;;  %v3084_v35 = vld [vmem:[%s4221_s0 + $0x340] sm:$0xff] }
  0x48   :  { %v2191_v53 = vpack.i.bf16 %v3084_v35, %v3089_v5 }
  0x49   :  { %2178 = vxpose.xlu1.b32.cont [2/16] (narrow) %v2177_v12, 24  ;;  %v3108_v12 = vld [vmem:[%s4221_s0 + $0x348] sm:$0xff] }
  0x4b   :  { %2131 = vxpose.xlu0.b32.cont [2/16] (narrow) %v2130_v26, 24  ;;  %v3113_v26 = vld [vmem:[%s4221_s0 + $0x3c8] sm:$0xff] }
  0x4d   :  { %2180 = vxpose.xlu1.b32.cont [3/16] (narrow) %v2179_v22, 24  ;;  %v2193_v22 = vpack.i.bf16 %v3108_v12, %v3113_v26 }
  0x4f   :  { %2133 = vxpose.xlu0.b32.cont [3/16] (narrow) %v2132_v24, 24  ;;  %v2146_v24 = vpack.i.bf16 %v3123_v7, %v3118_v31 }
  0x51   :  { %2182 = vxpose.xlu1.b32.cont [4/16] (narrow) %v2181_v48, 24  ;;  %v3132_v48 = vld [vmem:[%s4221_s0 + $0x350] sm:$0xff] }
  0x53   :  { %2135 = vxpose.xlu0.b32.cont [4/16] (narrow) %v2134_v57, 24  ;;  %v3137_v57 = vld [vmem:[%s4221_s0 + $0x3d0] sm:$0xff] }
  0x55   :  { %2184 = vxpose.xlu1.b32.cont [5/16] (narrow) %v2183_v47, 24  ;;  %v3142_v47 = vld [vmem:[%s4221_s0 + $0x250] sm:$0xff] }
  0x57   :  { %2137 = vxpose.xlu0.b32.cont [5/16] (narrow) %v2136_v56, 24  ;;  %v3147_v56 = vld [vmem:[%s4221_s0 + $0x2d0] sm:$0xff] }
  0x59   :  { %2186 = vxpose.xlu1.b32.cont [6/16] (narrow) %v2185_v29, 24  ;;  %v2195_v29 = vpack.i.bf16 %v3132_v48, %v3137_v57 }
  0x5b   :  { %2139 = vxpose.xlu0.b32.cont [6/16] (narrow) %v2138_v34, 24  ;;  %v2148_v34 = vpack.i.bf16 %v3147_v56, %v3142_v47 }
  0x5d   :  { %2188 = vxpose.xlu1.b32.cont [7/16] (narrow) %v2187_v16, 24  ;;  %v3156_v16 = vld [vmem:[%s4221_s0 + $0x358] sm:$0xff] }
  0x5f   :  { %2141 = vxpose.xlu0.b32.cont [7/16] (narrow) %v2140_v2, 24  ;;  %v3161_v2 = vld [vmem:[%s4221_s0 + $0x3d8] sm:$0xff] }
  0x61   :  { %2190 = vxpose.xlu1.b32.cont [8/16] (narrow) %v2189_v14, 24  ;;  %v3166_v14 = vld [vmem:[%s4221_s0 + $0x258] sm:$0xff] }
  0x63   :  { %2143 = vxpose.xlu0.b32.cont [8/16] (narrow) %v2142_v10, 24  ;;  %v3171_v10 = vld [vmem:[%s4221_s0 + $0x2d8] sm:$0xff] }
  0x65   :  { %2192 = vxpose.xlu1.b32.cont [9/16] (narrow) %v2191_v53, 24  ;;  %v2197_v53 = vpack.i.bf16 %v3156_v16, %v3161_v2 }
  0x67   :  { %2145 = vxpose.xlu0.b32.cont [9/16] (narrow) %v2144_v58, 24  ;;  %v2150_v58 = vpack.i.bf16 %v3171_v10, %v3166_v14 }
  0x69   :  { %2194 = vxpose.xlu1.b32.cont [10/16] (narrow) %v2193_v22, 24  ;;  %v3180_v22 = vld [vmem:[%s4221_s0 + $0x360] sm:$0xff] }
  0x6a   :  { %4283 = vst [vmem:[#allocation11_spill] sm:$0xff] %v3180_v22 }
  0x6b   :  { %2147 = vxpose.xlu0.b32.cont [10/16] (narrow) %v2146_v24, 24  ;;  %v3185_v24 = vld [vmem:[%s4221_s0 + $0x3e0] sm:$0xff] }
  0x6c   :  { %v2199_v25 = vpack.i.bf16 %v3180_v22, %v3185_v24  ;;  %v3257_v22 = vld [vmem:[%s4221_s0 + $0x3f8] sm:$0xff] }
  0x6d   :  { %2196 = vxpose.xlu1.b32.cont [11/16] (narrow) %v2195_v29, 24  ;;  %v3190_v29 = vld [vmem:[%s4221_s0 + $0x260] sm:$0xff]  ;;  %4292 = vst [vmem:[#allocation20_spill] sm:$0xff] %v3257_v22  ;;  %v2205_v18 = vpack.i.bf16 %v3252_v13, %v3257_v22  ;;  %v3293_v13 = vld [vmem:[%s4221_s0 + $0x488] sm:$0xff]  ;;  %v3309_v22 = vld [vmem:[%s4221_s0 + $0x590] sm:$0xff] }
  0x6e   :  { %4284 = vst [vmem:[#allocation12_spill] sm:$0xff] %v3190_v29  ;;  %4298 = vst [vmem:[#allocation26_spill] sm:$0xff] %v3293_v13 }
  0x6f   :  { %2149 = vxpose.xlu0.b32.cont [11/16] (narrow) %v2148_v34, 24  ;;  %v3195_v34 = vld [vmem:[%s4221_s0 + $0x2e0] sm:$0xff] }
  0x70   :  { %v2152_v52 = vpack.i.bf16 %v3195_v34, %v3190_v29  ;;  %v1847_v29 = vpack.c.bf16 %v2974_v50, %v2950_v39  ;;  %v3344_v39 = vld [vmem:[%s4221_s0 + $0x418] sm:$0xff]  ;;  %v4300_v50 = vpack.c.bf16 %v2607_v45, %v2602_v44  ;;  %v1881_v44 = vpack.c.bf16 %v3017_v55, %v2993_v23  ;;  %v3389_v55 = vld [vmem:[%s4221_s0 + $0x4a0] sm:$0xff] }
  0x71   :  { %2198 = vxpose.xlu1.b32.cont [12/16] (narrow) %v2197_v53, 24  ;;  %v3214_v53 = vld [vmem:[%s4221_s0 + $0x268] sm:$0xff]  ;;  %v1851_v23 = vpack.c.bf16 %v3022_v61, %v2998_v28  ;;  %v1853_v28 = vpack.c.bf16 %v3075_v21, %v3051_v60  ;;  %v1855_v60 = vpack.c.bf16 %v3070_v4, %v3046_v54  ;;  %v1857_v54 = vpack.c.bf16 %v3123_v7, %v3099_v33 }
  0x72   :  { %4286 = vst [vmem:[#allocation14_spill] sm:$0xff] %v3214_v53  ;;  %v1859_v7 = vpack.c.bf16 %v3118_v31, %v3094_v6  ;;  %v1861_v6 = vpack.c.bf16 %v3171_v10, %v3147_v56  ;;  %v1863_v56 = vpack.c.bf16 %v3166_v14, %v3142_v47  ;;  %v1895_v10 = vpack.c.bf16 %v3156_v16, %v3132_v48  ;;  %v3502_v48 = vld [vmem:[%s4221_s0 + $0x540] sm:$0xff] }
  0x73   :  { %2151 = vxpose.xlu0.b32.cont [12/16] (narrow) %v2150_v58, 24  ;;  %v3219_v58 = vld [vmem:[%s4221_s0 + $0x2e8] sm:$0xff]  ;;  %v3507_v16 = vld [vmem:[%s4221_s0 + $0x5c0] sm:$0xff] }
  0x74   :  { %v2154_v49 = vpack.i.bf16 %v3219_v58, %v3214_v53  ;;  %v1865_v47 = vpack.c.bf16 %v3219_v58, %v3195_v34 }
  0x75   :  { %2200 = vxpose.xlu1.b32.cont [13/16] (narrow) %v2199_v25, 24  ;;  %v3238_v25 = vld [vmem:[%s4221_s0 + $0x270] sm:$0xff]  ;;  %v4302_v34 = vld [vmem:[#allocation12_spill] sm:$0xff] }
  0x76   :  { %4289 = vst [vmem:[#allocation17_spill] sm:$0xff] %v3238_v25 }
  0x77   :  { %2153 = vxpose.xlu0.b32.cont [13/16] (narrow) %v2152_v52, 24  ;;  %v3243_v52 = vld [vmem:[%s4221_s0 + $0x2f0] sm:$0xff] }
  0x78   :  { %4290 = vst [vmem:[#allocation18_spill] sm:$0xff] %v3243_v52  ;;  %v2156_v20 = vpack.i.bf16 %v3243_v52, %v3238_v25  ;;  %v3281_v52 = vld [vmem:[%s4221_s0 + $0x480] sm:$0xff] }
  0x79   :  { %2202 = vxpose.xlu1.b32.cont [14/16] (narrow) %v2201_v42, 24  ;;  %v3262_v42 = vld [vmem:[%s4221_s0 + $0x278] sm:$0xff]  ;;  %4296 = vst [vmem:[#allocation24_spill] sm:$0xff] %v3281_v52  ;;  %v4303_v58 = vld [vmem:[#allocation14_spill] sm:$0xff] }
  0x7a   :  { %4293 = vst [vmem:[#allocation21_spill] sm:$0xff] %v3262_v42 }
  0x7b   :  { %2155 = vxpose.xlu0.b32.cont [14/16] (narrow) %v2154_v49, 24  ;;  %v3267_v49 = vld [vmem:[%s4221_s0 + $0x2f8] sm:$0xff] }
  0x7c   :  { %4294 = vst [vmem:[#allocation22_spill] sm:$0xff] %v3267_v49  ;;  %v2158_v25 = vpack.i.bf16 %v3267_v49, %v3262_v42  ;;  %v2222_v42 = vpack.i.bf16 %v2774_v19, %v3281_v52  ;;  %v1877_v49 = vpack.c.bf16 %v2969_v38, %v2941_v3  ;;  %v3349_v38 = vld [vmem:[%s4221_s0 + $0x498] sm:$0xff] }
  0x7d   :  { %2204 = vxpose.xlu1.b32.cont [15/16] (narrow) %v2203_v46, 24  ;;  %v2269_v46 = vpack.i.bf16 %v2755_v0, %v3276_v43  ;;  %v3304_v43 = vld [vmem:[%s4221_s0 + $0x510] sm:$0xff] }
  0x7e   :  { %4299 = vst [vmem:[#allocation27_spill] sm:$0xff] %v3304_v43 }
  0x7f   :  { %2157 = vxpose.xlu0.b32.cont [15/16] (narrow) %v2156_v20, 24  ;;  %v3288_v20 = vld [vmem:[%s4221_s0 + $0x588] sm:$0xff] }
  0x80   :  { %4297 = vst [vmem:[#allocation25_spill] sm:$0xff] %v3288_v20 }
  0x81   :  { %2206 = vxpose.xlu1.b32.end [16/16] (narrow) %v2205_v18, 24  ;;  %v2271_v18 = vpack.i.bf16 %v2760_v1, %v3288_v20  ;;  %v3314_v1 = vld [vmem:[%s4221_s0 + $0x410] sm:$0xff] }
  0x83   :  { %2159 = vxpose.xlu0.b32.end [16/16] (narrow) %v2158_v25, 24  ;;  %v2224_v25 = vpack.i.bf16 %v2779_v27, %v3293_v13  ;;  %v1845_v13 = vpack.c.bf16 %v2979_v37, %v2955_v51  ;;  %v3334_v51 = vld [vmem:[%s4221_s0 + $0x518] sm:$0xff] }
  0x85   :  { %2270 = vxpose.xlu1.b32.start [1/16] (narrow) %v2269_v46, 24  ;;  %v2113_v0 = vpop.trf.xlu1 }
  0x86   :  { %v2117_v46 = vunpack.i.h.bf16 %v2113_v0  ;;  %v2114_v52 = vunpack.i.l.bf16 %v2113_v0  ;;  %v2273_v0 = vpack.i.bf16 %v3304_v43, %v3309_v22 }
  0x87   :  { %2223 = vxpose.xlu0.b32.start [1/16] (narrow) %v2222_v42, 24  ;;  %v2066_v19 = vpop.trf.xlu0  ;;  %v3319_v42 = vld [vmem:[%s4221_s0 + $0x490] sm:$0xff] }
  0x88   :  { %v2070_v27 = vunpack.i.h.bf16 %v2066_v19  ;;  %v2067_v20 = vunpack.i.l.bf16 %v2066_v19  ;;  %932 = vmatprep.mubr.f32.mxu1 %v2117_v46  ;;  %v2226_v19 = vpack.i.bf16 %v3314_v1, %v3319_v42  ;;  %v1849_v46 = vpack.c.bf16 %v3027_v17, %v3003_v36  ;;  %v3384_v36 = vld [vmem:[%s4221_s0 + $0x420] sm:$0xff] }
  0x89   :  { %2272 = vxpose.xlu1.b32.cont [2/16] (narrow) %v2271_v18, 24  ;;  %v2118_v53 = vpop.trf.xlu1  ;;  %933 = vmatmul.mubr.f32.vlgmr.msra.gmra.mrb[0].mxu1 %v2114_v52  ;;  %v1883_v52 = vpack.c.bf16 %v3012_v62, %v2988_v63  ;;  %v3404_v63 = vld [vmem:[%s4221_s0 + $0x528] sm:$0xff] }
  0x8a   :  { %852 = vmatprep.mubr.f32.mxu0 %v2070_v27  ;;  %v3339_v27 = vld [vmem:[%s4221_s0 + $0x598] sm:$0xff]  ;;  %v2122_v18 = vunpack.i.h.bf16 %v2118_v53  ;;  %v2119_v17 = vunpack.i.l.bf16 %v2118_v53  ;;  %v1887_v53 = vpack.c.bf16 %v3060_v15, %v3036_v9  ;;  %v3437_v9 = vld [vmem:[%s4221_s0 + $0x530] sm:$0xff] }
  0x8b   :  { %2225 = vxpose.xlu0.b32.cont [2/16] (narrow) %v2224_v25, 24  ;;  %853 = vmatmul.mubr.f32.vlgmr.msra.gmra.mrb[0].mxu0 %v2067_v20  ;;  %v2071_v3 = vpop.trf.xlu0  ;;  %v1879_v20 = vpack.c.bf16 %v2964_v30, %v2936_v32  ;;  %v4301_v25 = vpack.c.bf16 %v2593_v41, %v2588_v40  ;;  %v2275_v43 = vpack.i.bf16 %v3334_v51, %v3339_v27  ;;  %v3372_v40 = vld [vmem:[%s4221_s0 + $0x520] sm:$0xff]  ;;  %v3442_v15 = vld [vmem:[%s4221_s0 + $0x5b0] sm:$0xff] }
  0x8c   :  { %1844 = vmatpush3.bf16.msra.mxu0 %v4300_v50  ;;  %v2075_v37 = vunpack.i.h.bf16 %v2071_v3  ;;  %v2228_v32 = vpack.i.bf16 %v3344_v39, %v3349_v38  ;;  %v3377_v41 = vld [vmem:[%s4221_s0 + $0x5a0] sm:$0xff]  ;;  %v2072_v30 = vunpack.i.l.bf16 %v2071_v3  ;;  %937 = vmatprep.mubr.f32.mxu1 %v2122_v18  ;;  %v1891_v50 = vpack.c.bf16 %v3108_v12, %v3084_v35  ;;  %v3470_v35 = vld [vmem:[%s4221_s0 + $0x538] sm:$0xff] }
  0x8d   :  { %1876 = vmatpush3.bf16.msra.mxu1 %v4301_v25  ;;  %1846 = vmatprep.subr.bf16.mxu0 %v1845_v13  ;;  %v3365_v45 = vpop.trf.xlu1  ;;  %v2277_v61 = vpack.i.bf16 %v3372_v40, %v3377_v41  ;;  %v2281_v31 = vpack.i.bf16 %v3437_v9, %v3442_v15  ;;  %v3475_v12 = vld [vmem:[%s4221_s0 + $0x5b8] sm:$0xff] }
  0x8e   :  { %2274 = vxpose.xlu1.b32.cont [3/16] (narrow) %v2273_v0, 24  ;;  %1878 = vmatprep.subr.bf16.mxu1 %v1877_v49  ;;  %v1885_v49 = vpack.c.bf16 %v3065_v11, %v3041_v8  ;;  %v3416_v8 = vld [vmem:[%s4221_s0 + $0x428] sm:$0xff]  ;;  %v2127_v21 = vunpack.i.h.bf16 %v3365_v45  ;;  %v1889_v0 = vpack.c.bf16 %v3113_v26, %v3089_v5  ;;  %v3449_v5 = vld [vmem:[%s4221_s0 + $0x430] sm:$0xff]  ;;  %v2124_v3 = vunpack.i.l.bf16 %v3365_v45 }
  0x8f   :  { %2227 = vxpose.xlu0.b32.cont [3/16] (narrow) %v2226_v19, 24  ;;  %857 = vmatprep.mubr.f32.mxu0 %v2075_v37  ;;  %v2076_v13 = vpop.trf.xlu0  ;;  %v3421_v11 = vld [vmem:[%s4221_s0 + $0x4a8] sm:$0xff]  ;;  %v3454_v26 = vld [vmem:[%s4221_s0 + $0x4b0] sm:$0xff]  ;;  %v1893_v37 = vpack.c.bf16 %v3161_v2, %v3137_v57  ;;  %v3482_v57 = vld [vmem:[%s4221_s0 + $0x438] sm:$0xff]  ;;  %v2283_v14 = vpack.i.bf16 %v3470_v35, %v3475_v12 }
  0x90   :  { %1848 = vmatpush3.bf16.msra.mxu0 %v1847_v29  ;;  %v2230_v29 = vpack.i.bf16 %v3384_v36, %v3389_v55  ;;  %v2080_v62 = vunpack.i.h.bf16 %v2076_v13  ;;  %938 = vmatmul.mubr.f32.gmra.mrb[2].mxu1 %v2119_v17  ;;  %v2232_v19 = vpack.i.bf16 %v3416_v8, %v3421_v11  ;;  %v2077_v33 = vunpack.i.l.bf16 %v2076_v13  ;;  %v3487_v2 = vld [vmem:[%s4221_s0 + $0x4b8] sm:$0xff]  ;;  %v4305_v45 = vld [vmem:[#allocation13_spill] sm:$0xff]  ;;  %v4306_v13 = vld [vmem:[#allocation18_spill] sm:$0xff] }
  0x91   :  { %1880 = vmatpush3.bf16.msra.mxu1 %v1879_v20  ;;  %1850 = vmatprep.subr.bf16.mxu0 %v1849_v46  ;;  %v2234_v18 = vpack.i.bf16 %v3449_v5, %v3454_v26  ;;  %v1897_v20 = vpack.c.bf16 %v3209_v59, %v3185_v24  ;;  %v2236_v25 = vpack.i.bf16 %v3482_v57, %v3487_v2  ;;  %v3514_v59 = vld [vmem:[%s4221_s0 + $0x440] sm:$0xff] }
  0x92   :  { %2276 = vxpose.xlu1.b32.cont [4/16] (narrow) %v2275_v43, 24  ;;  %1882 = vmatprep.subr.bf16.mxu1 %v1881_v44  ;;  %v3409_v43 = vld [vmem:[%s4221_s0 + $0x5a8] sm:$0xff]  ;;  %v1867_v46 = vpack.c.bf16 %v4303_v58, %v4302_v34  ;;  %v3519_v24 = vld [vmem:[%s4221_s0 + $0x4c0] sm:$0xff]  ;;  %v4304_v44 = vld [vmem:[#allocation11_spill] sm:$0xff]  ;;  %v2285_v17 = vpack.i.bf16 %v3502_v48, %v3507_v16 }
  0x93   :  { %2229 = vxpose.xlu0.b32.cont [4/16] (narrow) %v2228_v32, 24  ;;  %858 = vmatmul.mubr.f32.gmra.mrb[2].mxu0 %v2072_v30  ;;  %v2279_v4 = vpack.i.bf16 %v3404_v63, %v3409_v43  ;;  %v1899_v32 = vpack.c.bf16 %v4305_v45, %v4304_v44  ;;  %v4307_v30 = vld [vmem:[#allocation22_spill] sm:$0xff]  ;;  %v3590_v58 = vld [vmem:[%s4221_s0 + $0x558] sm:$0xff] }
  0x94   :  { %1852 = vmatpush3.bf16.msra.mxu0 %v1851_v23  ;;  %862 = vmatprep.mubr.f32.mxu0 %v2080_v62  ;;  %v1869_v23 = vpack.c.bf16 %v4307_v30, %v4306_v13  ;;  %v3539_v62 = vld [vmem:[%s4221_s0 + $0x5c8] sm:$0xff]  ;;  %v3600_v44 = vld [vmem:[%s4221_s0 + $0x458] sm:$0xff]  ;;  %v3614_v30 = vld [vmem:[%s4221_s0 + $0x560] sm:$0xff] }
  0x95   :  { %1884 = vmatpush3.bf16.msra.mxu1 %v1883_v52  ;;  %1854 = vmatprep.subr.bf16.mxu0 %v1853_v28  ;;  %v4308_v52 = vld [vmem:[#allocation16_spill] sm:$0xff]  ;;  %v3605_v45 = vld [vmem:[%s4221_s0 + $0x4d8] sm:$0xff] }
  0x96   :  { %2278 = vxpose.xlu1.b32.cont [5/16] (narrow) %v2277_v61, 24  ;;  %1886 = vmatprep.subr.bf16.mxu1 %v1885_v49  ;;  %v4309_v28 = vld [vmem:[#allocation20_spill] sm:$0xff]  ;;  %v2238_v49 = vpack.i.bf16 %v3514_v59, %v3519_v24  ;;  %v2244_v13 = vpack.i.bf16 %v3600_v44, %v3605_v45 }
  0x97   :  { %2231 = vxpose.xlu0.b32.cont [5/16] (narrow) %v2230_v29, 24  ;;  %942 = vmatprep.mubr.f32.mxu1 %v2127_v21  ;;  %v1901_v61 = vpack.c.bf16 %v4309_v28, %v4308_v52  ;;  %v3534_v29 = vld [vmem:[%s4221_s0 + $0x548] sm:$0xff]  ;;  %v3629_v52 = vld [vmem:[%s4221_s0 + $0x4e0] sm:$0xff] }
  0x98   :  { %1856 = vmatpush3.bf16.msra.mxu0 %v1855_v60  ;;  %943 = vmatmul.mubr.f32.gmra.mrb[4].mxu1 %v2124_v3  ;;  %v4310_v60 = vld [vmem:[#allocation17_spill] sm:$0xff]  ;;  %v4315_v3 = vld [vmem:[#allocation26_spill] sm:$0xff] }
  0x99   :  { %1888 = vmatpush3.bf16.msra.mxu1 %v1887_v53  ;;  %1858 = vmatprep.subr.bf16.mxu0 %v1857_v54  ;;  %v4311_v21 = vld [vmem:[#allocation21_spill] sm:$0xff] }
  0x9a   :  { %2280 = vxpose.xlu1.b32.cont [6/16] (narrow) %v2279_v4, 24  ;;  %1890 = vmatprep.subr.bf16.mxu1 %v1889_v0  ;;  %v1871_v53 = vpack.c.bf16 %v4311_v21, %v4310_v60  ;;  %v3546_v54 = vld [vmem:[%s4221_s0 + $0x448] sm:$0xff]  ;;  %v4312_v0 = vld [vmem:[#allocation15_spill] sm:$0xff] }
  0x9b   :  { %2233 = vxpose.xlu0.b32.cont [6/16] (narrow) %v2232_v19, 24  ;;  %863 = vmatmul.mubr.f32.gmra.mrb[4].mxu0 %v2077_v33  ;;  %v3551_v4 = vld [vmem:[%s4221_s0 + $0x4c8] sm:$0xff]  ;;  %v4313_v19 = vld [vmem:[#allocation19_spill] sm:$0xff] }
  0x9c   :  { %1860 = vmatpush3.bf16.msra.mxu0 %v1859_v7  ;;  %v1903_v33 = vpack.c.bf16 %v4313_v19, %v4312_v0  ;;  %v4314_v7 = vld [vmem:[#allocation24_spill] sm:$0xff]  ;;  %v3643_v60 = vld [vmem:[%s4221_s0 + $0x5e8] sm:$0xff] }
  0x9d   :  { %1892 = vmatpush3.bf16.msra.mxu1 %v1891_v50  ;;  %1862 = vmatprep.subr.bf16.mxu0 %v1861_v6  ;;  %v1905_v50 = vpack.c.bf16 %v4315_v3, %v4314_v7  ;;  %v4316_v6 = vld [vmem:[#allocation23_spill] sm:$0xff]  ;;  %v3648_v21 = vld [vmem:[%s4221_s0 + $0x468] sm:$0xff]  ;;  %v3667_v7 = vld [vmem:[%s4221_s0 + $0x5f0] sm:$0xff] }
  0x9e   :  { %2282 = vxpose.xlu1.b32.cont [7/16] (narrow) %v2281_v31, 24  ;;  %1894 = vmatprep.subr.bf16.mxu1 %v1893_v37  ;;  %v4317_v31 = vld [vmem:[#allocation25_spill] sm:$0xff]  ;;  %4320 = vst [vmem:[#allocation11_spill] sm:$0xff] %v3667_v7  ;;  %v3672_v3 = vld [vmem:[%s4221_s0 + $0x470] sm:$0xff] }
  0x9f   :  { %2235 = vxpose.xlu0.b32.cont [7/16] (narrow) %v2234_v18, 24  ;;  %v1937_v37 = vpack.c.bf16 %v4317_v31, %v4316_v6  ;;  %v2287_v18 = vpack.i.bf16 %v3534_v29, %v3539_v62  ;;  %4321 = vst [vmem:[#allocation13_spill] sm:$0xff] %v3672_v3 }
  0xa0   :  { %1864 = vmatpush3.bf16.msra.mxu0 %v1863_v56  ;;  %v2240_v56 = vpack.i.bf16 %v3546_v54, %v3551_v4 }
  0xa1   :  { %1896 = vmatpush3.bf16.msra.mxu1 %v1895_v10  ;;  %1866 = vmatprep.subr.bf16.mxu0 %v1865_v47  ;;  %v3566_v10 = vld [vmem:[%s4221_s0 + $0x550] sm:$0xff] }
  0xa2   :  { %2284 = vxpose.xlu1.b32.cont [8/16] (narrow) %v2283_v14, 24  ;;  %1898 = vmatprep.subr.bf16.mxu1 %v1897_v20  ;;  %v3571_v47 = vld [vmem:[%s4221_s0 + $0x5d0] sm:$0xff] }
  0xa3   :  { %2237 = vxpose.xlu0.b32.cont [8/16] (narrow) %v2236_v25, 24  ;;  %v3576_v14 = vld [vmem:[%s4221_s0 + $0x450] sm:$0xff]  ;;  %v2289_v25 = vpack.i.bf16 %v3566_v10, %v3571_v47 }
  0xa4   :  { %1868 = vmatpush3.bf16.msra.mxu0 %v1867_v46  ;;  %v3581_v20 = vld [vmem:[%s4221_s0 + $0x4d0] sm:$0xff]  ;;  %v3595_v46 = vld [vmem:[%s4221_s0 + $0x5d8] sm:$0xff] }
  0xa5   :  { %1900 = vmatpush3.bf16.msra.mxu1 %v1899_v32  ;;  %1870 = vmatprep.subr.bf16.mxu0 %v1869_v23  ;;  %v2242_v34 = vpack.i.bf16 %v3576_v14, %v3581_v20  ;;  %v2291_v32 = vpack.i.bf16 %v3590_v58, %v3595_v46  ;;  %v3619_v23 = vld [vmem:[%s4221_s0 + $0x5e0] sm:$0xff] }
  0xa6   :  { %2286 = vxpose.xlu1.b32.cont [9/16] (narrow) %v2285_v17, 24  ;;  %1902 = vmatprep.subr.bf16.mxu1 %v1901_v61  ;;  %v3624_v17 = vld [vmem:[%s4221_s0 + $0x460] sm:$0xff]  ;;  %v2293_v28 = vpack.i.bf16 %v3614_v30, %v3619_v23 }
  0xa7   :  { %2239 = vxpose.xlu0.b32.cont [9/16] (narrow) %v2238_v49, 24  ;;  %v2246_v61 = vpack.i.bf16 %v3624_v17, %v3629_v52  ;;  %v3638_v49 = vld [vmem:[%s4221_s0 + $0x568] sm:$0xff] }
  0xa8   :  { %1872 = vmatpush3.bf16.msra.mxu0 %v1871_v53  ;;  %4318 = vst [vmem:[#allocation12_spill] sm:$0xff] %v3638_v49  ;;  %v3653_v53 = vld [vmem:[%s4221_s0 + $0x4e8] sm:$0xff]  ;;  %v2295_v0 = vpack.i.bf16 %v3638_v49, %v3643_v60 }
  0xa9   :  { %1904 = vmatpush3.bf16.msra.mxu1 %v1903_v33  ;;  %1906 = vmatprep.subr.bf16.mxu0 %v1905_v50  ;;  %v2248_v19 = vpack.i.bf16 %v3648_v21, %v3653_v53  ;;  %v3662_v33 = vld [vmem:[%s4221_s0 + $0x570] sm:$0xff] }
  0xaa   :  { %2288 = vxpose.xlu1.b32.cont [10/16] (narrow) %v2287_v18, 24  ;;  %1938 = vmatprep.subr.bf16.mxu1 %v1937_v37  ;;  %4319 = vst [vmem:[#allocation14_spill] sm:$0xff] %v3662_v33  ;;  %v3677_v50 = vld [vmem:[%s4221_s0 + $0x4f0] sm:$0xff]  ;;  %v2297_v6 = vpack.i.bf16 %v3662_v33, %v3667_v7  ;;  %v3686_v37 = vld [vmem:[%s4221_s0 + $0x578] sm:$0xff] }
  0xab   :  { %2241 = vxpose.xlu0.b32.cont [10/16] (narrow) %v2240_v56, 24  ;;  %4322 = vst [vmem:[#allocation18_spill] sm:$0xff] %v3677_v50  ;;  %v2250_v31 = vpack.i.bf16 %v3672_v3, %v3677_v50  ;;  %4323 = vst [vmem:[#allocation22_spill] sm:$0xff] %v3686_v37  ;;  %v3691_v18 = vld [vmem:[%s4221_s0 + $0x5f8] sm:$0xff]  ;;  %v3743_v3 = vld [vmem:[%s4221_s0 + $0x790] sm:$0xff]  ;;  %v1913_v50 = vpack.c.bf16 %v3421_v11, %v3389_v55 }
  0xac   :  { %4324 = vst [vmem:[#allocation16_spill] sm:$0xff] %v3691_v18  ;;  %v3696_v56 = vld [vmem:[%s4221_s0 + $0x478] sm:$0xff]  ;;  %4336 = vst [vmem:[#allocation23_spill] sm:$0xff] %v3743_v3  ;;  %v3811_v55 = vld [vmem:[%s4221_s0 + $0x7a0] sm:$0xff] }
  0xad   :  { %4325 = vst [vmem:[#allocation20_spill] sm:$0xff] %v3696_v56 }
  0xae   :  { %2290 = vxpose.xlu1.b32.cont [11/16] (narrow) %v2289_v25, 24  ;;  %v3701_v25 = vld [vmem:[%s4221_s0 + $0x4f8] sm:$0xff] }
  0xaf   :  { %2243 = vxpose.xlu0.b32.cont [11/16] (narrow) %v2242_v34, 24  ;;  %4326 = vst [vmem:[#allocation17_spill] sm:$0xff] %v3701_v25  ;;  %v2299_v34 = vpack.i.bf16 %v3686_v37, %v3691_v18  ;;  %v1941_v18 = vpack.c.bf16 %v3339_v27, %v3309_v22  ;;  %v3783_v27 = vld [vmem:[%s4221_s0 + $0x698] sm:$0xff] }
  0xb2   :  { %2292 = vxpose.xlu1.b32.cont [12/16] (narrow) %v2291_v32, 24  ;;  %v2252_v32 = vpack.i.bf16 %v3696_v56, %v3701_v25  ;;  %v3738_v56 = vld [vmem:[%s4221_s0 + $0x710] sm:$0xff]  ;;  %v1911_v25 = vpack.c.bf16 %v3344_v39, %v3314_v1  ;;  %v3778_v1 = vld [vmem:[%s4221_s0 + $0x618] sm:$0xff] }
  0xb3   :  { %2245 = vxpose.xlu0.b32.cont [12/16] (narrow) %v2244_v13, 24  ;;  %v3710_v13 = vld [vmem:[%s4221_s0 + $0x780] sm:$0xff]  ;;  %4335 = vst [vmem:[#allocation26_spill] sm:$0xff] %v3738_v56  ;;  %v4339_v39 = vld [vmem:[#allocation6_spill] sm:$0xff] }
  0xb4   :  { %4327 = vst [vmem:[#allocation21_spill] sm:$0xff] %v3710_v13 }
  0xb6   :  { %2294 = vxpose.xlu1.b32.cont [13/16] (narrow) %v2293_v28, 24  ;;  %v3715_v28 = vld [vmem:[%s4221_s0 + $0x680] sm:$0xff] }
  0xb7   :  { %2247 = vxpose.xlu0.b32.cont [13/16] (narrow) %v2246_v61, 24  ;;  %4328 = vst [vmem:[#allocation15_spill] sm:$0xff] %v3715_v28  ;;  %v4329_v61 = vld [vmem:[#allocation7_spill] sm:$0xff] }
  0xba   :  { %2296 = vxpose.xlu1.b32.cont [14/16] (narrow) %v2295_v0, 24  ;;  %v2363_v0 = vpack.i.bf16 %v4329_v61, %v3710_v13  ;;  %v4334_v61 = vld [vmem:[#allocation10_spill] sm:$0xff] }
  0xbb   :  { %2249 = vxpose.xlu0.b32.cont [14/16] (narrow) %v2248_v19, 24  ;;  %v3722_v19 = vld [vmem:[%s4221_s0 + $0x788] sm:$0xff] }
  0xbc   :  { %4330 = vst [vmem:[#allocation19_spill] sm:$0xff] %v3722_v19 }
  0xbe   :  { %2298 = vxpose.xlu1.b32.cont [15/16] (narrow) %v2297_v6, 24  ;;  %v3727_v6 = vld [vmem:[%s4221_s0 + $0x688] sm:$0xff] }
  0xbf   :  { %2251 = vxpose.xlu0.b32.cont [15/16] (narrow) %v2250_v31, 24  ;;  %4331 = vst [vmem:[#allocation24_spill] sm:$0xff] %v3727_v6  ;;  %v4332_v31 = vld [vmem:[#allocation9_spill] sm:$0xff] }
  0xc0   :  { %v2316_v37 = vpack.i.bf16 %v4332_v31, %v3715_v28 }
  0xc2   :  { %2300 = vxpose.xlu1.b32.end [16/16] (narrow) %v2299_v34, 24  ;;  %v4333_v34 = vld [vmem:[#allocation8_spill] sm:$0xff] }
  0xc3   :  { %2253 = vxpose.xlu0.b32.end [16/16] (narrow) %v2252_v32, 24  ;;  %v2365_v33 = vpack.i.bf16 %v4333_v34, %v3722_v19  ;;  %v2318_v32 = vpack.i.bf16 %v4334_v61, %v3727_v6  ;;  %v3748_v34 = vld [vmem:[%s4221_s0 + $0x610] sm:$0xff]  ;;  %v1909_v6 = vpack.c.bf16 %v3349_v38, %v3319_v42  ;;  %v3768_v42 = vld [vmem:[%s4221_s0 + $0x718] sm:$0xff] }
  0xc4   :  { %4337 = vst [vmem:[#allocation25_spill] sm:$0xff] %v3748_v34  ;;  %v3773_v38 = vld [vmem:[%s4221_s0 + $0x798] sm:$0xff] }
  0xc5   :  { %v2207_v13 = vpop.trf.xlu1  ;;  %v2369_v49 = vpack.i.bf16 %v3768_v42, %v3773_v38 }
  0xc6   :  { %2364 = vxpose.xlu1.b32.start [1/16] (narrow) %v2363_v0, 24  ;;  %v2211_v0 = vunpack.i.h.bf16 %v2207_v13  ;;  %v2208_v28 = vunpack.i.l.bf16 %v2207_v13  ;;  %v2367_v13 = vpack.i.bf16 %v3738_v56, %v3743_v3  ;;  %v4343_v56 = vld [vmem:[#allocation4_spill] sm:$0xff] }
  0xc7   :  { %2317 = vxpose.xlu0.b32.start [1/16] (narrow) %v2316_v37, 24  ;;  %v2160_v31 = vpop.trf.xlu0  ;;  %v3753_v37 = vld [vmem:[%s4221_s0 + $0x690] sm:$0xff] }
  0xc8   :  { %4338 = vst [vmem:[#allocation28_spill] sm:$0xff] %v3753_v37  ;;  %v2161_v61 = vunpack.i.l.bf16 %v2160_v31  ;;  %v2164_v19 = vunpack.i.h.bf16 %v2160_v31  ;;  %1092 = vmatprep.mubr.f32.mxu1 %v2208_v28  ;;  %v2320_v31 = vpack.i.bf16 %v3748_v34, %v3753_v37  ;;  %v4342_v34 = vld [vmem:[#allocation27_spill] sm:$0xff] }
  0xc9   :  { %v2212_v7 = vpop.trf.xlu1  ;;  %1093 = vmatmul.mubr.f32.vlgmr.msra.gmra.mrb[6].mxu1 %v2211_v0  ;;  %v4344_v37 = vld [vmem:[#allocation3_spill] sm:$0xff]  ;;  %v1945_v0 = vpack.c.bf16 %v3409_v43, %v3377_v41  ;;  %v1915_v41 = vpack.c.bf16 %v3416_v8, %v3384_v36  ;;  %v3818_v43 = vld [vmem:[%s4221_s0 + $0x620] sm:$0xff]  ;;  %v1917_v36 = vpack.c.bf16 %v3487_v2, %v3454_v26  ;;  %v1919_v2 = vpack.c.bf16 %v3482_v57, %v3449_v5 }
  0xca   :  { %2366 = vxpose.xlu1.b32.cont [2/16] (narrow) %v2365_v33, 24  ;;  %1012 = vmatprep.mubr.f32.mxu0 %v2164_v19  ;;  %v4340_v33 = vld [vmem:[#allocation5_spill] sm:$0xff]  ;;  %v4345_v3 = vpack.c.bf16 %v4343_v56, %v4344_v37  ;;  %v3823_v56 = vld [vmem:[%s4221_s0 + $0x6a0] sm:$0xff]  ;;  %v1949_v37 = vpack.c.bf16 %v3475_v12, %v3442_v15  ;;  %v1921_v5 = vpack.c.bf16 %v3551_v4, %v3519_v24 }
  0xcb   :  { %2319 = vxpose.xlu0.b32.cont [2/16] (narrow) %v2318_v32, 24  ;;  %1013 = vmatmul.mubr.f32.vlgmr.msra.gmra.mrb[6].mxu0 %v2161_v61  ;;  %v2165_v22 = vpop.trf.xlu0  ;;  %v4341_v28 = vpack.c.bf16 %v4339_v39, %v4340_v33  ;;  %v2213_v32 = vunpack.i.l.bf16 %v2212_v7  ;;  %v1943_v61 = vpack.c.bf16 %v3334_v51, %v4342_v34  ;;  %v2322_v51 = vpack.i.bf16 %v3778_v1, %v3783_v27  ;;  %v3850_v15 = vld [vmem:[%s4221_s0 + $0x628] sm:$0xff] }
  0xcc   :  { %v2169_v19 = vunpack.i.h.bf16 %v2165_v22  ;;  %1940 = vmatpush3.bf16.msra.mxu1 %v4345_v3  ;;  %v3806_v3 = vld [vmem:[%s4221_s0 + $0x720] sm:$0xff]  ;;  %v1947_v34 = vpack.c.bf16 %v3404_v63, %v3372_v40  ;;  %v3838_v40 = vld [vmem:[%s4221_s0 + $0x728] sm:$0xff]  ;;  %v1923_v4 = vpack.c.bf16 %v3546_v54, %v3514_v59  ;;  %v1925_v59 = vpack.c.bf16 %v3605_v45, %v3581_v20 }
  0xcd   :  { %1908 = vmatpush3.bf16.msra.mxu0 %v4341_v28  ;;  %1942 = vmatprep.subr.bf16.mxu1 %v1941_v18  ;;  %v3799_v39 = vpop.trf.xlu1  ;;  %v2166_v18 = vunpack.i.l.bf16 %v2165_v22  ;;  %v2371_v8 = vpack.i.bf16 %v3806_v3, %v3811_v55  ;;  %v3843_v63 = vld [vmem:[%s4221_s0 + $0x7a8] sm:$0xff]  ;;  %v1955_v22 = vpack.c.bf16 %v3534_v29, %v3502_v48  ;;  %v1957_v33 = vpack.c.bf16 %v3595_v46, %v3571_v47  ;;  %v3904_v48 = vld [vmem:[%s4221_s0 + $0x738] sm:$0xff] }
  0xce   :  { %1910 = vmatprep.subr.bf16.mxu0 %v1909_v6  ;;  %2368 = vxpose.xlu1.b32.cont [3/16] (narrow) %v2367_v13, 24  ;;  %v2216_v6 = vunpack.i.h.bf16 %v2212_v7  ;;  %v2324_v7 = vpack.i.bf16 %v3818_v43, %v3823_v56  ;;  %v3855_v12 = vld [vmem:[%s4221_s0 + $0x6a8] sm:$0xff]  ;;  %v2373_v57 = vpack.i.bf16 %v3838_v40, %v3843_v63  ;;  %v3909_v29 = vld [vmem:[%s4221_s0 + $0x7b8] sm:$0xff]  ;;  %v1927_v20 = vpack.c.bf16 %v3600_v44, %v3576_v14 }
  0xcf   :  { %2321 = vxpose.xlu0.b32.cont [3/16] (narrow) %v2320_v31, 24  ;;  %1017 = vmatprep.mubr.f32.mxu0 %v2169_v19  ;;  %v2170_v11 = vpop.trf.xlu0  ;;  %v2326_v13 = vpack.i.bf16 %v3850_v15, %v3855_v12  ;;  %v2221_v31 = vunpack.i.h.bf16 %v3799_v39  ;;  %v3916_v47 = vld [vmem:[%s4221_s0 + $0x638] sm:$0xff]  ;;  %v1959_v45 = vpack.c.bf16 %v3590_v58, %v3566_v10  ;;  %v1929_v14 = vpack.c.bf16 %v3653_v53, %v3629_v52  ;;  %v3936_v10 = vld [vmem:[%s4221_s0 + $0x740] sm:$0xff] }
  0xd0   :  { %1097 = vmatprep.mubr.f32.mxu1 %v2213_v32  ;;  %1944 = vmatpush3.bf16.msra.mxu1 %v1943_v61  ;;  %v2174_v26 = vunpack.i.h.bf16 %v2170_v11  ;;  %v2171_v24 = vunpack.i.l.bf16 %v2170_v11  ;;  %v3921_v46 = vld [vmem:[%s4221_s0 + $0x6b8] sm:$0xff]  ;;  %v2377_v44 = vpack.i.bf16 %v3904_v48, %v3909_v29  ;;  %v1961_v19 = vpack.c.bf16 %v3643_v60, %v3619_v23  ;;  %v3941_v58 = vld [vmem:[%s4221_s0 + $0x7c0] sm:$0xff] }
  0xd1   :  { %1912 = vmatpush3.bf16.msra.mxu0 %v1911_v25  ;;  %1946 = vmatprep.subr.bf16.mxu1 %v1945_v0  ;;  %v1953_v25 = vpack.c.bf16 %v3539_v62, %v3507_v16  ;;  %v3883_v16 = vld [vmem:[%s4221_s0 + $0x630] sm:$0xff]  ;;  %v2330_v32 = vpack.i.bf16 %v3916_v47, %v3921_v46  ;;  %v1931_v52 = vpack.c.bf16 %v3648_v21, %v3624_v17  ;;  %v3948_v23 = vld [vmem:[%s4221_s0 + $0x640] sm:$0xff]  ;;  %v4349_v21 = vld [vmem:[#allocation11_spill] sm:$0xff] }
  0xd2   :  { %1914 = vmatprep.subr.bf16.mxu0 %v1913_v50  ;;  %2370 = vxpose.xlu1.b32.cont [4/16] (narrow) %v2369_v49, 24  ;;  %v2218_v49 = vunpack.i.l.bf16 %v3799_v39  ;;  %v1951_v50 = vpack.c.bf16 %v3470_v35, %v3437_v9  ;;  %v3871_v9 = vld [vmem:[%s4221_s0 + $0x730] sm:$0xff]  ;;  %v3953_v60 = vld [vmem:[%s4221_s0 + $0x6c0] sm:$0xff]  ;;  %v4348_v39 = vld [vmem:[#allocation17_spill] sm:$0xff]  ;;  %v2379_v17 = vpack.i.bf16 %v3936_v10, %v3941_v58 }
  0xd3   :  { %2323 = vxpose.xlu0.b32.cont [4/16] (narrow) %v2322_v51, 24  ;;  %1018 = vmatmul.mubr.f32.gmra.mrb[8].mxu0 %v2166_v18  ;;  %v3876_v35 = vld [vmem:[%s4221_s0 + $0x7b0] sm:$0xff]  ;;  %v4346_v53 = vld [vmem:[#allocation12_spill] sm:$0xff] }
  0xd4   :  { %1098 = vmatmul.mubr.f32.gmra.mrb[8].mxu1 %v2216_v6  ;;  %1022 = vmatprep.mubr.f32.mxu0 %v2174_v26  ;;  %v3888_v62 = vld [vmem:[%s4221_s0 + $0x6b0] sm:$0xff]  ;;  %v2375_v54 = vpack.i.bf16 %v3871_v9, %v3876_v35  ;;  %v1963_v61 = vpack.c.bf16 %v4346_v53, %v3614_v30  ;;  %v4350_v11 = vld [vmem:[#allocation16_spill] sm:$0xff]  ;;  %v3968_v30 = vld [vmem:[%s4221_s0 + $0x748] sm:$0xff] }
  0xd5   :  { %1916 = vmatpush3.bf16.msra.mxu0 %v1915_v41  ;;  %1948 = vmatpush3.bf16.msra.mxu1 %v1947_v34  ;;  %v2328_v28 = vpack.i.bf16 %v3883_v16, %v3888_v62  ;;  %v4347_v0 = vld [vmem:[#allocation18_spill] sm:$0xff]  ;;  %v1965_v18 = vpack.c.bf16 %v4350_v11, %v4349_v21  ;;  %v2332_v41 = vpack.i.bf16 %v3948_v23, %v3953_v60  ;;  %v3973_v6 = vld [vmem:[%s4221_s0 + $0x7c8] sm:$0xff]  ;;  %v4048_v53 = vld [vmem:[%s4221_s0 + $0x760] sm:$0xff] }
  0xd6   :  { %1918 = vmatprep.subr.bf16.mxu0 %v1917_v36  ;;  %2372 = vxpose.xlu1.b32.cont [5/16] (narrow) %v2371_v8, 24  ;;  %v1933_v51 = vpack.c.bf16 %v4348_v39, %v4347_v0  ;;  %v4351_v34 = vld [vmem:[#allocation13_spill] sm:$0xff]  ;;  %v4352_v36 = vld [vmem:[#allocation20_spill] sm:$0xff]  ;;  %v4353_v26 = vld [vmem:[#allocation14_spill] sm:$0xff] }
  0xd7   :  { %1950 = vmatprep.subr.bf16.mxu1 %v1949_v37  ;;  %2325 = vxpose.xlu0.b32.cont [5/16] (narrow) %v2324_v7, 24  ;;  %v1935_v8 = vpack.c.bf16 %v4352_v36, %v4351_v34  ;;  %v3980_v37 = vld [vmem:[%s4221_s0 + $0x648] sm:$0xff]  ;;  %v4058_v0 = vld [vmem:[%s4221_s0 + $0x660] sm:$0xff] }
  0xd8   :  { %1102 = vmatprep.mubr.f32.mxu1 %v2218_v49  ;;  %1023 = vmatmul.mubr.f32.gmra.mrb[10].mxu0 %v2171_v24  ;;  %v3985_v7 = vld [vmem:[%s4221_s0 + $0x6c8] sm:$0xff]  ;;  %v4063_v39 = vld [vmem:[%s4221_s0 + $0x6e0] sm:$0xff] }
  0xd9   :  { %1920 = vmatpush3.bf16.msra.mxu0 %v1919_v2  ;;  %1952 = vmatpush3.bf16.msra.mxu1 %v1951_v50  ;;  %v4354_v2 = vld [vmem:[#allocation22_spill] sm:$0xff]  ;;  %v4355_v50 = vld [vmem:[#allocation15_spill] sm:$0xff]  ;;  %v4072_v21 = vld [vmem:[%s4221_s0 + $0x768] sm:$0xff] }
  0xda   :  { %1922 = vmatprep.subr.bf16.mxu0 %v1921_v5  ;;  %2374 = vxpose.xlu1.b32.cont [6/16] (narrow) %v2373_v57, 24  ;;  %v1967_v49 = vpack.c.bf16 %v4354_v2, %v4353_v26  ;;  %v4356_v5 = vld [vmem:[#allocation24_spill] sm:$0xff]  ;;  %v4077_v11 = vld [vmem:[%s4221_s0 + $0x7e8] sm:$0xff]  ;;  %v4101_v26 = vld [vmem:[%s4221_s0 + $0x7f0] sm:$0xff] }
  0xdb   :  { %1954 = vmatprep.subr.bf16.mxu1 %v1953_v25  ;;  %2327 = vxpose.xlu0.b32.cont [6/16] (narrow) %v2326_v13, 24  ;;  %v1969_v57 = vpack.c.bf16 %v4356_v5, %v4355_v50  ;;  %v4357_v25 = vld [vmem:[#allocation21_spill] sm:$0xff]  ;;  %v4358_v13 = vld [vmem:[#allocation19_spill] sm:$0xff]  ;;  %v2389_v34 = vpack.i.bf16 %v4072_v21, %v4077_v11  ;;  %v4106_v2 = vld [vmem:[%s4221_s0 + $0x670] sm:$0xff] }
  0xdc   :  { %1103 = vmatmul.mubr.f32.gmra.mrb[10].mxu1 %v2221_v31  ;;  %v2001_v24 = vpack.c.bf16 %v4358_v13, %v4357_v25  ;;  %v2334_v31 = vpack.i.bf16 %v3980_v37, %v3985_v7  ;;  %4360 = vst [vmem:[#allocation5_spill] sm:$0xff] %v4106_v2  ;;  %v4125_v25 = vld [vmem:[%s4221_s0 + $0x7f8] sm:$0xff] }
  0xdd   :  { %1924 = vmatpush3.bf16.msra.mxu0 %v1923_v4  ;;  %1956 = vmatpush3.bf16.msra.mxu1 %v1955_v22  ;;  %v2381_v4 = vpack.i.bf16 %v3968_v30, %v3973_v6  ;;  %v4000_v22 = vld [vmem:[%s4221_s0 + $0x750] sm:$0xff]  ;;  %v4130_v13 = vld [vmem:[%s4221_s0 + $0x678] sm:$0xff] }
  0xde   :  { %1926 = vmatprep.subr.bf16.mxu0 %v1925_v59  ;;  %2376 = vxpose.xlu1.b32.cont [7/16] (narrow) %v2375_v54, 24  ;;  %v4005_v59 = vld [vmem:[%s4221_s0 + $0x7d0] sm:$0xff]  ;;  %4363 = vst [vmem:[#allocation3_spill] sm:$0xff] %v4130_v13 }
  0xdf   :  { %1958 = vmatprep.subr.bf16.mxu1 %v1957_v33  ;;  %2329 = vxpose.xlu0.b32.cont [7/16] (narrow) %v2328_v28, 24  ;;  %v4010_v54 = vld [vmem:[%s4221_s0 + $0x650] sm:$0xff]  ;;  %v2383_v28 = vpack.i.bf16 %v4000_v22, %v4005_v59 }
  0xe0   :  { %v4015_v33 = vld [vmem:[%s4221_s0 + $0x6d0] sm:$0xff] }
  0xe1   :  { %1928 = vmatpush3.bf16.msra.mxu0 %v1927_v20  ;;  %1960 = vmatpush3.bf16.msra.mxu1 %v1959_v45  ;;  %v2336_v20 = vpack.i.bf16 %v4010_v54, %v4015_v33  ;;  %v4024_v45 = vld [vmem:[%s4221_s0 + $0x758] sm:$0xff] }
  0xe2   :  { %1930 = vmatprep.subr.bf16.mxu0 %v1929_v14  ;;  %2378 = vxpose.xlu1.b32.cont [8/16] (narrow) %v2377_v44, 24  ;;  %v4029_v14 = vld [vmem:[%s4221_s0 + $0x7d8] sm:$0xff] }
  0xe3   :  { %1962 = vmatprep.subr.bf16.mxu1 %v1961_v19  ;;  %2331 = vxpose.xlu0.b32.cont [8/16] (narrow) %v2330_v32, 24  ;;  %v4034_v44 = vld [vmem:[%s4221_s0 + $0x658] sm:$0xff]  ;;  %v2385_v32 = vpack.i.bf16 %v4024_v45, %v4029_v14 }
  0xe4   :  { %v4039_v19 = vld [vmem:[%s4221_s0 + $0x6d8] sm:$0xff] }
  0xe5   :  { %1932 = vmatpush3.bf16.msra.mxu0 %v1931_v52  ;;  %1964 = vmatpush3.bf16.msra.mxu1 %v1963_v61  ;;  %v2338_v52 = vpack.i.bf16 %v4034_v44, %v4039_v19  ;;  %v4053_v61 = vld [vmem:[%s4221_s0 + $0x7e0] sm:$0xff] }
  0xe6   :  { %1934 = vmatprep.subr.bf16.mxu0 %v1933_v51  ;;  %2380 = vxpose.xlu1.b32.cont [9/16] (narrow) %v2379_v17, 24  ;;  %v2387_v51 = vpack.i.bf16 %v4048_v53, %v4053_v61  ;;  %v2340_v17 = vpack.i.bf16 %v4058_v0, %v4063_v39 }
  0xe7   :  { %1966 = vmatprep.subr.bf16.mxu1 %v1965_v18  ;;  %2333 = vxpose.xlu0.b32.cont [9/16] (narrow) %v2332_v41, 24  ;;  %v4082_v18 = vld [vmem:[%s4221_s0 + $0x668] sm:$0xff] }
  0xe8   :  { %v4087_v41 = vld [vmem:[%s4221_s0 + $0x6e8] sm:$0xff] }
  0xe9   :  { %1936 = vmatpush3.bf16.msra.mxu0 %v1935_v8  ;;  %1968 = vmatpush3.bf16.msra.mxu1 %v1967_v49  ;;  %v2342_v36 = vpack.i.bf16 %v4082_v18, %v4087_v41  ;;  %v4096_v8 = vld [vmem:[%s4221_s0 + $0x770] sm:$0xff] }
  0xea   :  { %1970 = vmatprep.subr.bf16.mxu0 %v1969_v57  ;;  %2382 = vxpose.xlu1.b32.cont [10/16] (narrow) %v2381_v4, 24  ;;  %4359 = vst [vmem:[#allocation6_spill] sm:$0xff] %v4096_v8  ;;  %v4111_v49 = vld [vmem:[%s4221_s0 + $0x6f0] sm:$0xff]  ;;  %v2391_v50 = vpack.i.bf16 %v4096_v8, %v4101_v26  ;;  %v4120_v57 = vld [vmem:[%s4221_s0 + $0x778] sm:$0xff]  ;;  %v4368_v8 = vld [vmem:[#allocation25_spill] sm:$0xff] }
  0xeb   :  { %2002 = vmatprep.subr.bf16.mxu1 %v2001_v24  ;;  %2335 = vxpose.xlu0.b32.cont [10/16] (narrow) %v2334_v31, 24  ;;  %4361 = vst [vmem:[#allocation27_spill] sm:$0xff] %v4111_v49  ;;  %v2344_v5 = vpack.i.bf16 %v4106_v2, %v4111_v49  ;;  %4362 = vst [vmem:[#allocation4_spill] sm:$0xff] %v4120_v57  ;;  %v4135_v24 = vld [vmem:[%s4221_s0 + $0x6f8] sm:$0xff]  ;;  %v2393_v4 = vpack.i.bf16 %v4120_v57, %v4125_v25  ;;  %v4367_v57 = vld [vmem:[#allocation26_spill] sm:$0xff] }
  0xec   :  { %4364 = vst [vmem:[#allocation12_spill] sm:$0xff] %v4135_v24  ;;  %v2346_v31 = vpack.i.bf16 %v4130_v13, %v4135_v24  ;;  %v4370_v13 = vld [vmem:[#allocation7_spill] sm:$0xff] }
  0xee   :  { %2384 = vxpose.xlu1.b32.cont [11/16] (narrow) %v2383_v28, 24 }
  0xef   :  { %2337 = vxpose.xlu0.b32.cont [11/16] (narrow) %v2336_v20, 24  ;;  %v4365_v20 = vld [vmem:[#allocation23_spill] sm:$0xff] }
  0xf2   :  { %2386 = vxpose.xlu1.b32.cont [12/16] (narrow) %v2385_v32, 24  ;;  %v2005_v32 = vpack.c.bf16 %v3773_v38, %v4365_v20  ;;  %v2009_v38 = vpack.c.bf16 %v3843_v63, %v3811_v55  ;;  %v2011_v55 = vpack.c.bf16 %v3838_v40, %v3806_v3  ;;  %v1979_v63 = vpack.c.bf16 %v3850_v15, %v3818_v43 }
  0xf3   :  { %2339 = vxpose.xlu0.b32.cont [12/16] (narrow) %v2338_v52, 24  ;;  %v1981_v3 = vpack.c.bf16 %v3921_v46, %v3888_v62  ;;  %v2015_v43 = vpack.c.bf16 %v3904_v48, %v3871_v9  ;;  %v2017_v40 = vpack.c.bf16 %v3973_v6, %v3941_v58  ;;  %v1985_v15 = vpack.c.bf16 %v3985_v7, %v3953_v60  ;;  %v4376_v60 = vld [vmem:[#allocation12_spill] sm:$0xff]  ;;  %v4377_v6 = vld [vmem:[#allocation6_spill] sm:$0xff] }
  0xf4   :  { %v1987_v9 = vpack.c.bf16 %v3980_v37, %v3948_v23  ;;  %v2023_v62 = vpack.c.bf16 %v4024_v45, %v4000_v22  ;;  %v1991_v48 = vpack.c.bf16 %v4034_v44, %v4010_v54  ;;  %v2027_v46 = vpack.c.bf16 %v4072_v21, %v4048_v53  ;;  %v4375_v23 = vld [vmem:[#allocation27_spill] sm:$0xff]  ;;  %v4378_v37 = vld [vmem:[#allocation4_spill] sm:$0xff]  ;;  %v4379_v22 = vld [vmem:[#allocation5_spill] sm:$0xff] }
  0xf5   :  { %v2029_v58 = vpack.c.bf16 %v4125_v25, %v4101_v26  ;;  %v2031_v7 = vpack.c.bf16 %v4378_v37, %v4377_v6 }
  0xf6   :  { %2388 = vxpose.xlu1.b32.cont [13/16] (narrow) %v2387_v51, 24 }
  0xf7   :  { %2341 = vxpose.xlu0.b32.cont [13/16] (narrow) %v2340_v17, 24 }
  0xfa   :  { %2390 = vxpose.xlu1.b32.cont [14/16] (narrow) %v2389_v34, 24 }
  0xfb   :  { %2343 = vxpose.xlu0.b32.cont [14/16] (narrow) %v2342_v36, 24 }
  0xfe   :  { %2392 = vxpose.xlu1.b32.cont [15/16] (narrow) %v2391_v50, 24  ;;  %v4366_v50 = vld [vmem:[#allocation28_spill] sm:$0xff] }
  0xff   :  { %2345 = vxpose.xlu0.b32.cont [15/16] (narrow) %v2344_v5, 24  ;;  %v1973_v2 = vpack.c.bf16 %v3783_v27, %v4366_v50  ;;  %v2007_v5 = vpack.c.bf16 %v3768_v42, %v4367_v57  ;;  %v4372_v42 = vld [vmem:[#allocation10_spill] sm:$0xff]  ;;  %v4373_v57 = vld [vmem:[#allocation9_spill] sm:$0xff] }
 0x100   :  { %v4374_v49 = vpack.c.bf16 %v4372_v42, %v4373_v57 }
 0x102   :  { %2394 = vxpose.xlu1.b32.end [16/16] (narrow) %v2393_v4, 24  ;;  %v1975_v4 = vpack.c.bf16 %v3778_v1, %v4368_v8  ;;  %v1977_v1 = vpack.c.bf16 %v3855_v12, %v3823_v56  ;;  %v1983_v56 = vpack.c.bf16 %v3916_v47, %v3883_v16  ;;  %v2019_v12 = vpack.c.bf16 %v3968_v30, %v3936_v10 }
 0x103   :  { %2347 = vxpose.xlu0.b32.end [16/16] (narrow) %v2346_v31, 24  ;;  %v1989_v16 = vpack.c.bf16 %v4039_v19, %v4015_v33  ;;  %v1993_v47 = vpack.c.bf16 %v4087_v41, %v4063_v39  ;;  %v1995_v10 = vpack.c.bf16 %v4082_v18, %v4058_v0  ;;  %v1997_v30 = vpack.c.bf16 %v4376_v60, %v4375_v23 }
 0x106   :  { %v2301_v28 = vpop.trf.xlu1 }
 0x107   :  { %v2254_v52 = vpop.trf.xlu0  ;;  %v2305_v51 = vunpack.i.h.bf16 %v2301_v28  ;;  %v2302_v17 = vunpack.i.l.bf16 %v2301_v28 }
 0x108   :  { %v2258_v34 = vunpack.i.h.bf16 %v2254_v52  ;;  %v2255_v36 = vunpack.i.l.bf16 %v2254_v52 }
 0x109   :  { %1252 = vmatprep.mubr.f32.mxu1 %v2302_v17  ;;  %v4369_v17 = vld [vmem:[#allocation8_spill] sm:$0xff] }
 0x10a   :  { %1172 = vmatprep.mubr.f32.mxu0 %v2255_v36  ;;  %v2306_v31 = vpop.trf.xlu1  ;;  %1253 = vmatmul.mubr.f32.vlgmr.msra.gmra.mrb[12].mxu1 %v2305_v51  ;;  %v4371_v24 = vpack.c.bf16 %v4369_v17, %v4370_v13  ;;  %v2013_v13 = vpack.c.bf16 %v3909_v29, %v3876_v35  ;;  %v2021_v35 = vpack.c.bf16 %v4029_v14, %v4005_v59  ;;  %v4380_v59 = vld [vmem:[#allocation3_spill] sm:$0xff] }
 0x10b   :  { %v2259_v20 = vpop.trf.xlu0  ;;  %1173 = vmatmul.mubr.f32.vlgmr.msra.gmra.mrb[12].mxu0 %v2258_v34  ;;  %v2307_v28 = vunpack.i.l.bf16 %v2306_v31  ;;  %v2310_v52 = vunpack.i.h.bf16 %v2306_v31  ;;  %v2025_v29 = vpack.c.bf16 %v4077_v11, %v4053_v61  ;;  %v1999_v54 = vpack.c.bf16 %v4380_v59, %v4379_v22 }
 0x10c   :  { %2004 = vmatpush3.bf16.msra.mxu1 %v4371_v24  ;;  %v2260_v27 = vunpack.i.l.bf16 %v2259_v20  ;;  %v2263_v50 = vunpack.i.h.bf16 %v2259_v20  ;;  %1972 = vmatpush3.bf16.msra.mxu0 %v4374_v49 }
 0x10d   :  { %2006 = vmatprep.subr.bf16.mxu1 %v2005_v32  ;;  %1257 = vmatprep.mubr.f32.mxu1 %v2307_v28 }
 0x10e   :  { %1974 = vmatprep.subr.bf16.mxu0 %v1973_v2  ;;  %1177 = vmatprep.mubr.f32.mxu0 %v2260_v27  ;;  %v2311_v8 = vpop.trf.xlu1 }
 0x10f   :  { %1258 = vmatmul.mubr.f32.gmra.mrb[14].mxu1 %v2310_v52  ;;  %v2264_v24 = vpop.trf.xlu0  ;;  %1178 = vmatmul.mubr.f32.gmra.mrb[14].mxu0 %v2263_v50  ;;  %v2312_v49 = vunpack.i.l.bf16 %v2311_v8  ;;  %v2315_v32 = vunpack.i.h.bf16 %v2311_v8 }
 0x110   :  { %2008 = vmatpush3.bf16.msra.mxu1 %v2007_v5  ;;  %v2265_v2 = vunpack.i.l.bf16 %v2264_v24  ;;  %v2268_v51 = vunpack.i.h.bf16 %v2264_v24  ;;  %1976 = vmatpush3.bf16.msra.mxu0 %v1975_v4 }
 0x111   :  { %2010 = vmatprep.subr.bf16.mxu1 %v2009_v38  ;;  %1262 = vmatprep.mubr.f32.mxu1 %v2312_v49 }
 0x112   :  { %1978 = vmatprep.subr.bf16.mxu0 %v1977_v1  ;;  %1182 = vmatprep.mubr.f32.mxu0 %v2265_v2 }
 0x113   :  { %1263 = vmatmul.mubr.f32.gmra.mrb[16].mxu1 %v2315_v32  ;;  %1183 = vmatmul.mubr.f32.gmra.mrb[16].mxu0 %v2268_v51 }
 0x114   :  { %2012 = vmatpush3.bf16.msra.mxu1 %v2011_v55  ;;  %1980 = vmatpush3.bf16.msra.mxu0 %v1979_v63 }
 0x115   :  { %2014 = vmatprep.subr.bf16.mxu1 %v2013_v13  ;;  %1982 = vmatprep.subr.bf16.mxu0 %v1981_v3 }
 0x118   :  { %2016 = vmatpush3.bf16.msra.mxu1 %v2015_v43  ;;  %1984 = vmatpush3.bf16.msra.mxu0 %v1983_v56  ;;  %v2410_v43 = vmov 0.0  }
 0x119   :  { %2018 = vmatprep.subr.bf16.mxu1 %v2017_v40  ;;  %1986 = vmatprep.subr.bf16.mxu0 %v1985_v15  ;;  %13 = vst.msk [vmem:[#allocation2] sm:$0xff] %vm12_vm0, %v2410_v43  ;;  %14 = vst.msk [vmem:[#allocation2 + $0x8] sm:$0xff] %vm12_vm0, %v2410_v43 }
 0x11a   :  { %16 = vst.msk [vmem:[#allocation2 + $0x10] sm:$0x3] %vm15_vm1, %v2410_v43 }
 0x11c   :  { %2020 = vmatpush3.bf16.msra.mxu1 %v2019_v12  ;;  %1988 = vmatpush3.bf16.msra.mxu0 %v1987_v9 }
 0x11d   :  { %2022 = vmatprep.subr.bf16.mxu1 %v2021_v35  ;;  %1990 = vmatprep.subr.bf16.mxu0 %v1989_v16 }
 0x120   :  { %2024 = vmatpush3.bf16.msra.mxu1 %v2023_v62  ;;  %1992 = vmatpush3.bf16.msra.mxu0 %v1991_v48 }
 0x121   :  { %2026 = vmatprep.subr.bf16.mxu1 %v2025_v29  ;;  %1994 = vmatprep.subr.bf16.mxu0 %v1993_v47 }
 0x124   :  { %2028 = vmatpush3.bf16.msra.mxu1 %v2027_v46  ;;  %1996 = vmatpush3.bf16.msra.mxu0 %v1995_v10 }
 0x125   :  { %2030 = vmatprep.subr.bf16.mxu1 %v2029_v58  ;;  %1998 = vmatprep.subr.bf16.mxu0 %v1997_v30 }
 0x128   :  { %2032 = vmatpush3.bf16.msra.mxu1 %v2031_v7  ;;  %2000 = vmatpush3.bf16.msra.mxu0 %v1999_v54 }
 0x146   :  { %v2395_v33 = vpop.trf.xlu1 }
 0x147   :  { %v2399_v45 = vunpack.i.h.bf16 %v2395_v33  ;;  %v2348_v14 = vpop.trf.xlu0  ;;  %v2396_v44 = vunpack.i.l.bf16 %v2395_v33 }
 0x148   :  { %v2352_v19 = vunpack.i.h.bf16 %v2348_v14  ;;  %v2349_v53 = vunpack.i.l.bf16 %v2348_v14 }
 0x149   :  { %1412 = vmatprep.mubr.f32.mxu1 %v2396_v44 }
 0x14a   :  { %1332 = vmatprep.mubr.f32.mxu0 %v2349_v53  ;;  %v2400_v61 = vpop.trf.xlu1  ;;  %1413 = vmatmul.mubr.f32.vlgmr.msra.gmra.mrb[18].mxu1 %v2399_v45 }
 0x14b   :  { %v2353_v0 = vpop.trf.xlu0  ;;  %1333 = vmatmul.mubr.f32.vlgmr.msra.gmra.mrb[18].mxu0 %v2352_v19  ;;  %v2401_v39 = vunpack.i.l.bf16 %v2400_v61  ;;  %v2404_v21 = vunpack.i.h.bf16 %v2400_v61 }
 0x14c   :  { %v2354_v11 = vunpack.i.l.bf16 %v2353_v0  ;;  %v2357_v18 = vunpack.i.h.bf16 %v2353_v0 }
 0x14d   :  { %1417 = vmatprep.mubr.f32.mxu1 %v2401_v39 }
 0x14e   :  { %1337 = vmatprep.mubr.f32.mxu0 %v2354_v11  ;;  %v2405_v41 = vpop.trf.xlu1  ;;  %1418 = vmatmul.mubr.f32.gmra.mrb[20].mxu1 %v2404_v21 }
 0x14f   :  { %v2409_v26 = vunpack.i.h.bf16 %v2405_v41  ;;  %v2406_v25 = vunpack.i.l.bf16 %v2405_v41  ;;  %v2358_v34 = vpop.trf.xlu0  ;;  %1338 = vmatmul.mubr.f32.gmra.mrb[20].mxu0 %v2357_v18 }
 0x150   :  { %v2362_v36 = vunpack.i.h.bf16 %v2358_v34  ;;  %v2359_v5 = vunpack.i.l.bf16 %v2358_v34 }
 0x151   :  { %1422 = vmatprep.mubr.f32.mxu1 %v2406_v25 }
 0x152   :  { %1342 = vmatprep.mubr.f32.mxu0 %v2359_v5  ;;  %1423 = vmatmul.mubr.f32.gmra.mrb[22].mxu1 %v2409_v26 }
 0x153   :  { %1343 = vmatmul.mubr.f32.gmra.mrb[22].mxu0 %v2362_v36 }
 0x15c   :  { %v1522_v38 = vpop.f32.mrb[0].mxu1 }
 0x15d   :  { %v1523_v28 = vpop.f32.mrb[1].mxu1 }
 0x15e   :  { %v1481_v4 = vpop.f32.mrb[0].mxu0  ;;  %v1524_v52 = vadd.f32 %v1523_v28, %v1522_v38 }
 0x15f   :  { %v1482_v31 = vpop.f32.mrb[1].mxu0 }
 0x160   :  { %v1483_v20 = vadd.f32 %v1482_v31, %v1481_v4 }
 0x162   :  { %v935_v17 = vadd.f32 %v1524_v52, %v1483_v20 }
 0x163   :  { %v1525_v42 = vpop.f32.mrb[2].mxu1 }
 0x164   :  { %v1526_v1 = vpop.f32.mrb[3].mxu1 }
 0x165   :  { %v1527_v55 = vadd.f32 %v1526_v1, %v1525_v42 }
 0x166   :  { %v1484_v27 = vpop.f32.mrb[2].mxu0 }
 0x167   :  { %v1485_v50 = vpop.f32.mrb[3].mxu0 }
 0x168   :  { %v1486_v57 = vadd.f32 %v1485_v50, %v1484_v27 }
 0x16a   :  { %v940_v63 = vadd.f32 %v1527_v55, %v1486_v57 }
 0x16b   :  { %v1528_v24 = vpop.f32.mrb[4].mxu1 }
 0x16c   :  { %v1529_v32 = vpop.f32.mrb[5].mxu1 }
 0x16d   :  { %v1530_v2 = vadd.f32 %v1529_v32, %v1528_v24  ;;  %v273_v24 = vld [vmem:[#allocation2] sm:$0xff] }
 0x16e   :  { %v1487_v8 = vpop.f32.mrb[4].mxu0 }
 0x16f   :  { %v1488_v13 = vpop.f32.mrb[5].mxu0 }
 0x170   :  { %v1489_v49 = vadd.f32 %v1488_v13, %v1487_v8 }
 0x172   :  { %v945_v51 = vadd.f32 %v1530_v2, %v1489_v49 }
 0x19c   :  { %v1604_v40 = vpop.f32.mrb[6].mxu1 }
 0x19d   :  { %v1605_v12 = vpop.f32.mrb[7].mxu1 }
 0x19e   :  { %v1563_v3 = vpop.f32.mrb[6].mxu0  ;;  %v1606_v9 = vadd.f32 %v1605_v12, %v1604_v40  ;;  %v274_v12 = vld [vmem:[#allocation2 + $0x8] sm:$0xff] }
 0x19f   :  { %v1564_v56 = vpop.f32.mrb[7].mxu0 }
 0x1a0   :  { %v1565_v15 = vadd.f32 %v1564_v56, %v1563_v3 }
 0x1a2   :  { %v1015_v35 = vadd.f32 %v1565_v15, %v935_v17 }
 0x1a4   :  { %v1095_v16 = vadd.f32 %v1606_v9, %v1015_v35 }
 0x1a6   :  { %v1566_v62 = vpop.f32.mrb[8].mxu0 }
 0x1a7   :  { %v1567_v48 = vpop.f32.mrb[9].mxu0  ;;  %v1607_v29 = vpop.f32.mrb[8].mxu1 }
 0x1a8   :  { %v1568_v47 = vadd.f32 %v1567_v48, %v1566_v62  ;;  %v1608_v46 = vpop.f32.mrb[9].mxu1 }
 0x1a9   :  { %v1609_v10 = vadd.f32 %v1608_v46, %v1607_v29 }
 0x1aa   :  { %v1020_v58 = vadd.f32 %v1568_v47, %v940_v63  ;;  %v275_v47 = vld [vmem:[#allocation2 + $0x10] sm:$0x3] }
 0x1ab   :  { %v1569_v60 = vpop.f32.mrb[10].mxu0 }
 0x1ac   :  { %v1100_v23 = vadd.f32 %v1609_v10, %v1020_v58  ;;  %v1570_v30 = vpop.f32.mrb[11].mxu0 }
 0x1ad   :  { %v1571_v37 = vadd.f32 %v1570_v30, %v1569_v60 }
 0x1af   :  { %v1610_v6 = vpop.f32.mrb[10].mxu1  ;;  %v1025_v59 = vadd.f32 %v1571_v37, %v945_v51 }
 0x1b0   :  { %v1611_v7 = vpop.f32.mrb[11].mxu1 }
 0x1b1   :  { %v1612_v22 = vadd.f32 %v1611_v7, %v1610_v6 }
 0x1b3   :  { %v1105_v54 = vadd.f32 %v1612_v22, %v1025_v59 }
 0x1dd   :  { %v1686_v33 = vpop.f32.mrb[12].mxu1 }
 0x1de   :  { %v1645_v45 = vpop.f32.mrb[12].mxu0  ;;  %v1687_v14 = vpop.f32.mrb[13].mxu1 }
 0x1df   :  { %v1646_v44 = vpop.f32.mrb[13].mxu0  ;;  %v1688_v19 = vadd.f32 %v1687_v14, %v1686_v33 }
 0x1e0   :  { %v1647_v53 = vadd.f32 %v1646_v44, %v1645_v45 }
 0x1e2   :  { %v1689_v61 = vpop.f32.mrb[14].mxu1  ;;  %v1175_v0 = vadd.f32 %v1647_v53, %v1095_v16  ;;  %v1648_v39 = vpop.f32.mrb[14].mxu0 }
 0x1e3   :  { %v1690_v21 = vpop.f32.mrb[15].mxu1  ;;  %v1649_v11 = vpop.f32.mrb[15].mxu0 }
 0x1e4   :  { %v1691_v18 = vadd.f32 %v1690_v21, %v1689_v61  ;;  %v1255_v41 = vadd.f32 %v1688_v19, %v1175_v0  ;;  %v1650_v26 = vadd.f32 %v1649_v11, %v1648_v39 }
 0x1e6   :  { %v1692_v25 = vpop.f32.mrb[16].mxu1  ;;  %v1180_v34 = vadd.f32 %v1650_v26, %v1100_v23  ;;  %v1651_v36 = vpop.f32.mrb[16].mxu0 }
 0x1e7   :  { %v1693_v5 = vpop.f32.mrb[17].mxu1  ;;  %v1652_v4 = vpop.f32.mrb[17].mxu0 }
 0x1e8   :  { %v1694_v31 = vadd.f32 %v1693_v5, %v1692_v25  ;;  %v1260_v38 = vadd.f32 %v1691_v18, %v1180_v34  ;;  %v1653_v20 = vadd.f32 %v1652_v4, %v1651_v36 }
 0x1ea   :  { %v1185_v28 = vadd.f32 %v1653_v20, %v1105_v54 }
 0x1ec   :  { %v1265_v52 = vadd.f32 %v1694_v31, %v1185_v28 }
 0x21d   :  { %v1768_v17 = vpop.f32.mrb[18].mxu1 }
 0x21e   :  { %v1727_v27 = vpop.f32.mrb[18].mxu0  ;;  %v1769_v50 = vpop.f32.mrb[19].mxu1 }
 0x21f   :  { %v1728_v42 = vpop.f32.mrb[19].mxu0  ;;  %v1770_v57 = vadd.f32 %v1769_v50, %v1768_v17 }
 0x220   :  { %v1729_v1 = vadd.f32 %v1728_v42, %v1727_v27 }
 0x221   :  { %v1771_v55 = vpop.f32.mrb[20].mxu1 }
 0x222   :  { %v1335_v63 = vadd.f32 %v1729_v1, %v1255_v41  ;;  %v1730_v8 = vpop.f32.mrb[20].mxu0  ;;  %v1772_v13 = vpop.f32.mrb[21].mxu1 }
 0x223   :  { %v1731_v49 = vpop.f32.mrb[21].mxu0  ;;  %v1773_v32 = vadd.f32 %v1772_v13, %v1771_v55 }
 0x224   :  { %v1415_v2 = vadd.f32 %v1770_v57, %v1335_v63  ;;  %v1732_v51 = vadd.f32 %v1731_v49, %v1730_v8 }
 0x225   :  { %v1774_v3 = vpop.f32.mrb[22].mxu1 }
 0x226   :  { %v1428_v43 = vadd.f32 %v1415_v2, %v273_v24  ;;  %v1340_v56 = vadd.f32 %v1732_v51, %v1260_v38  ;;  %v1733_v40 = vpop.f32.mrb[22].mxu0  ;;  %v1775_v15 = vpop.f32.mrb[23].mxu1 }
 0x227   :  { %v1734_v9 = vpop.f32.mrb[23].mxu0  ;;  %v1776_v35 = vadd.f32 %v1775_v15, %v1774_v3 }
 0x228   :  { %1432 = vst.msk [vmem:[#allocation2] sm:$0xff] %vm12_vm0, %v1428_v43  ;;  %v1420_v16 = vadd.f32 %v1773_v32, %v1340_v56  ;;  %v1735_v62 = vadd.f32 %v1734_v9, %v1733_v40 }
 0x22a   :  { %v1429_v48 = vadd.f32 %v1420_v16, %v274_v12  ;;  %v1345_v29 = vadd.f32 %v1735_v62, %v1265_v52 }
 0x22c   :  { %1433 = vst.msk [vmem:[#allocation2 + $0x8] sm:$0xff] %vm12_vm0, %v1429_v48  ;;  %v1425_v46 = vadd.f32 %v1776_v35, %v1345_v29 }
 0x22e   :  { %v1430_v10 = vadd.f32 %v1425_v46, %v275_v47 }
 0x22f   :  { %v1439_v58 = vld [vmem:[#allocation2] sm:$0xff] }
 0x230   :  { %1435 = vst.msk [vmem:[#allocation2 + $0x10] sm:$0x3] %vm15_vm1, %v1430_v10 }
 0x231   :  { %1442 = vst.msk [vmem:[%s4222_s1] sm:$0xff] %vm12_vm0, %v1439_v58 }
 0x233   :  { %v1440_v23 = vld [vmem:[#allocation2 + $0x8] sm:$0xff] }
 0x234   :  { %1443 = vst.msk [vmem:[%s4222_s1 + $0x8] sm:$0xff] %vm12_vm0, %v1440_v23 }
 0x237   :  { %v1441_v60 = vld [vmem:[#allocation2 + $0x10] sm:$0x3] }
 0x238   :  { %1444 = vst.msk [vmem:[%s4222_s1 + $0x10] sm:$0x3] %vm15_vm1, %v1441_v60 }

</bundles_post_ra>
